<compile_context>
chip_gen: v6e
topology: v6e:2x2x1
jax: 0.10.0
libtpu: 0.0.40
codegen_flags: <defaults>
</compile_context>

<pallas_src>
import functools

import jax
import jax.numpy as jnp
from jax.experimental import pallas as pl
from jax.experimental.pallas import tpu as pltpu

LANE = 128
BN_EPS = 1e-5                 # nn.BatchNorm2d default
NEG_PAD = -1.0e20             # pre-BN pad value; fused BN+ReLU maps it to 0


def _round_up(x, m):
    return (x + m - 1) // m * m


def _pick_tm(M):
    """M tile that divides round_up(M, 8); prefer >= 2 tiles (v7x megacore)."""
    Mp = _round_up(M, 8)
    single = None
    for tm in (512, 384, 256, 128, 64, 32, 16, 8):
        if Mp % tm == 0:
            if Mp // tm >= 2:
                return tm, Mp
            if single is None:
                single = tm
    return (single if single is not None else Mp), Mp


def _pick_tn(Cp):
    # 256 matches the v7x/v6e MXU output width when it divides Cp.
    return 256 if Cp % 256 == 0 else 128


def _pick_tk(K, TM, TN):
    """Largest K tile dividing K (prefer whole-K) that keeps tiles in VMEM."""
    for tk in (2048, 1536, 1152, 1024, 768, 640, 512, 384, 256, 128):
        if tk <= K and K % tk == 0:
            fp = 2 * 2 * (TM * tk + tk * TN) + 4 * TM * TN
            if fp <= 24 * 1024 * 1024:
                return tk
    return 128


# ----------------------------- Pallas kernels ------------------------------ #

def _mm_stats_kernel(*refs, fuse_bn):
    """Tiled im2col matmul with optional fused input BN+ReLU and per-tile
    BN statistics.  grid = (M tiles, N tiles, K tiles); the f32 accumulator
    is resident across the K axis (init at k==0, writeback at k==last)."""
    if fuse_bn:
        x_ref, s_ref, b_ref, w_ref, y_ref, stat_ref, acc_ref = refs
    else:
        x_ref, w_ref, y_ref, stat_ref, acc_ref = refs
    k = pl.program_id(2)

    @pl.when(k == 0)
    def _():
        acc_ref[...] = jnp.zeros_like(acc_ref)

    x = x_ref[...]
    if fuse_bn:                     # BN+ReLU of the *previous* conv, fused here
        h = x.astype(jnp.float32) * s_ref[...] + b_ref[...]
        x = jnp.maximum(h, 0.0).astype(jnp.bfloat16)
    acc_ref[...] += jnp.dot(x, w_ref[...], preferred_element_type=jnp.float32)

    @pl.when(k == pl.num_programs(2) - 1)
    def _():
        y = acc_ref[...]
        y_ref[...] = y.astype(y_ref.dtype)                      # bf16 writeback
        # per-(M tile, N tile) partial sums for training-mode BatchNorm stats
        stat_ref[0:1, :] = jnp.sum(y, axis=0, keepdims=True)
        stat_ref[1:2, :] = jnp.sum(y * y, axis=0, keepdims=True)


def _bn_add_relu_kernel(y_ref, s_ref, b_ref, r_ref, rs_ref, rb_ref, o_ref):
    # BN(main) + BN(shortcut) + residual add + final ReLU, fused; f32 math.
    y = y_ref[...].astype(jnp.float32) * s_ref[...] + b_ref[...]
    r = r_ref[...].astype(jnp.float32) * rs_ref[...] + rb_ref[...]
    o_ref[...] = jnp.maximum(y + r, 0.0).astype(o_ref.dtype)


# --------------------------- pallas_call wrappers --------------------------- #

def _matmul_stats(cols, w_mat, TM, scale_k=None, bias_k=None):
    Mp, K = cols.shape
    Cp = w_mat.shape[1]
    TN = _pick_tn(Cp)
    TK = _pick_tk(K, TM, TN)
    nmt, nnt, nkt = Mp // TM, Cp // TN, K // TK
    fuse_bn = scale_k is not None

    in_specs = [pl.BlockSpec((TM, TK), lambda i, n, k: (i, k))]
    args = [cols]
    if fuse_bn:
        sb_spec = pl.BlockSpec((1, TK), lambda i, n, k: (0, k))
        in_specs += [sb_spec, sb_spec]
        args += [scale_k, bias_k]
    in_specs.append(pl.BlockSpec((TK, TN), lambda i, n, k: (k, n)))
    args.append(w_mat)

    # double-buffered bf16 in/out + f32 accumulator (+stats), with headroom
    tile_bytes = (2 * 2 * (TM * TK + TK * TN + TM * TN)
                  + 4 * TM * TN + 2 * 4 * 8 * TN)
    vmem_limit = int(min(48 * 1024 * 1024, max(8 * 1024 * 1024, 3 * tile_bytes)))

    y, stats = pl.pallas_call(
        functools.partial(_mm_stats_kernel, fuse_bn=fuse_bn),
        out_shape=[jax.ShapeDtypeStruct((Mp, Cp), jnp.bfloat16),
                   jax.ShapeDtypeStruct((nmt * 8, Cp), jnp.float32)],
        grid=(nmt, nnt, nkt),
        in_specs=in_specs,
        out_specs=[pl.BlockSpec((TM, TN), lambda i, n, k: (i, n)),
                   pl.BlockSpec((8, TN), lambda i, n, k: (i, n))],
        scratch_shapes=[pltpu.VMEM((TM, TN), jnp.float32)],
        compiler_params=pltpu.CompilerParams(
            dimension_semantics=("parallel", "parallel", "arbitrary"),
            vmem_limit_bytes=vmem_limit),
    )(*args)
    return y, stats


def _bn_add_relu(y, s, b, r, rs, rb):
    """relu(BN(main) + BN(shortcut)); bf16 in/out, f32 math, big HBM blocks."""
    Mp, Cp = y.shape
    cap = max(8, (8 * 1024 * 1024) // (Cp * 2))       # ~8 MiB per streamed operand
    TMb = Mp
    if Mp > cap:
        for tm in (8192, 4096, 2048, 1024, 512, 256, 128, 64, 32, 16, 8):
            if tm <= cap and Mp % tm == 0:
                TMb = tm
                break
    big = pl.BlockSpec((TMb, Cp), lambda i: (i, 0))
    row = pl.BlockSpec((1, Cp), lambda i: (0, 0))
    return pl.pallas_call(
        _bn_add_relu_kernel,
        out_shape=jax.ShapeDtypeStruct((Mp, Cp), jnp.bfloat16),
        grid=(Mp // TMb,),
        in_specs=[big, row, row, big, row, row],
        out_specs=big,
        input_output_aliases={0: 0},          # write result over the main branch
        compiler_params=pltpu.CompilerParams(
            dimension_semantics=("parallel",)),
    )(y, s, b, r, rs, rb)


# ------------------------------ JAX glue ----------------------------------- #

def _weight_to_mat(w_oikk, cin_p, cout_p):
    """PyTorch Conv2d weight [O, I, kh, kw] -> padded im2col matrix (bf16)."""
    O, I, kh, kw = (int(d) for d in w_oikk.shape)
    wm = jnp.transpose(w_oikk.astype(jnp.float32), (2, 3, 1, 0))    # [kh,kw,I,O]
    wm = jnp.pad(wm, ((0, 0), (0, 0), (0, cin_p - I), (0, cout_p - O)))
    return wm.reshape(kh * kw * cin_p, cout_p).astype(jnp.bfloat16)


def _pad_vec(v, n):
    v = jnp.asarray(v, jnp.float32).reshape(-1)
    return jnp.pad(v, (0, n - v.shape[0]))


def _run_conv(cols, M, w_oikk, cin_p, cout_p,
              in_scale=None, in_bias=None, gamma=None, beta=None):
    """One conv as an [M,K]@[K,Cp] matmul, optionally with the previous layer's
    BN+ReLU fused into the input prologue.  Returns (pre-BN bf16 output of
    shape [Mp, Cp], this conv's BN scale [1, Cp], bias [1, Cp]) using
    training-mode batch statistics over the M real rows."""
    kh, kw = int(w_oikk.shape[2]), int(w_oikk.shape[3])
    K = cols.shape[1]
    assert K == kh * kw * cin_p
    TM, Mp = _pick_tm(M)
    if Mp != M:
        # padded rows must map to h == 0 so BN stats are unaffected
        pad_val = NEG_PAD if in_scale is not None else 0.0
        cols = jnp.pad(cols, ((0, Mp - M), (0, 0)), constant_values=pad_val)

    sk = bk = None
    if in_scale is not None:
        reps = kh * kw
        sk = in_scale if reps == 1 else jnp.tile(in_scale, (1, reps))
        bk = in_bias if reps == 1 else jnp.tile(in_bias, (1, reps))

    w_mat = _weight_to_mat(w_oikk, cin_p, cout_p)
    y, stats = _matmul_stats(cols, w_mat, TM, sk, bk)

    # training-mode BatchNorm2d batch statistics over the M real rows
    sums = jnp.sum(stats[0::8], axis=0)
    sqs = jnp.sum(stats[1::8], axis=0)
    mean = sums / M
    var = jnp.maximum(sqs / M - mean * mean, 0.0)       # biased variance
    # TODO(synk): E[x^2]-E[x]^2 in f32 can cancel for channels with large means.
    g = jnp.ones((cout_p,), jnp.float32) if gamma is None else _pad_vec(gamma, cout_p)
    be = jnp.zeros((cout_p,), jnp.float32) if beta is None else _pad_vec(beta, cout_p)
    scale = g * jax.lax.rsqrt(var + BN_EPS)
    bias = be - mean * scale
    return y, scale[None, :], bias[None, :]


def _im2col_3x3(x_nhwc, stride, pad_value):
    """[N,H,W,C] -> ([N*Ho*Wo, 9*C], (Ho, Wo)); 3x3 window, pad=1, given stride.
    Pads with `pad_value` (pre-BN space) instead of 0."""
    N, H, W, C = x_nhwc.shape
    xp = jnp.pad(x_nhwc, ((0, 0), (1, 1), (1, 1), (0, 0)),
                 constant_values=pad_value)
    Ho = (H - 1) // stride + 1
    Wo = (W - 1) // stride + 1
    taps = []
    for i in range(3):
        for j in range(3):
            taps.append(xp[:, i:i + stride * (Ho - 1) + 1:stride,
                           j:j + stride * (Wo - 1) + 1:stride, :])
    patches = jnp.stack(taps, axis=3)                   # [N, Ho, Wo, 9, C]
    return patches.reshape(N * Ho * Wo, 9 * C), (Ho, Wo)


def bottleneck_forward(x_nchw, params, *, downsample=True):
    """Bottleneck(in_c, out_c, downsample, inference='non_bayes', PreAc=False):
       main:     1x1 (BN,ReLU) -> 3x3 stride s pad 1 (BN,ReLU) -> 1x1 (BN)
       shortcut: 1x1 stride s (BN)
       out = relu(main + shortcut); BN uses training-mode batch stats with
       default affine (gamma=1, beta=0) unless params provide g*/be*."""
    in_c = int(params["w1"].shape[1])
    mid_c = int(params["w1"].shape[0])
    out_c = int(params["w3"].shape[0])
    in_p, mid_p, out_p = (_round_up(c, LANE) for c in (in_c, mid_c, out_c))
    s2 = 2 if downsample else 1

    N, _, H, W = x_nchw.shape
    # TODO(synk): in a ResNet stack keep activations in padded-NHWC bf16 across
    # blocks; this boundary transpose/pad/cast is a per-block HBM pass.
    x = jnp.transpose(x_nchw, (0, 2, 3, 1)).astype(jnp.float32)
    x = jnp.pad(x, ((0, 0), (0, 0), (0, 0), (0, in_p - in_c))).astype(jnp.bfloat16)

    # conv1: 1x1 stride 1 (its BN+ReLU is fused into conv2's input prologue)
    M1 = N * H * W
    cols1 = x.reshape(M1, in_p)
    y1, s1, b1 = _run_conv(cols1, M1, params["w1"], in_p, mid_p,
                           gamma=params.get("g1"), beta=params.get("be1"))

    # conv2: 3x3 stride s pad 1, consuming BN1+ReLU(y1) via the fused prologue
    if y1.shape[0] != M1:
        y1 = y1[:M1]
    # TODO(synk): XLA-side 9-tap im2col is still ~9x the minimal read of y1;
    # replace with in-VMEM halo'd tap construction.
    cols2, (Ho, Wo) = _im2col_3x3(y1.reshape(N, H, W, mid_p), s2, NEG_PAD)
    M2 = N * Ho * Wo
    y2, s2v, b2 = _run_conv(cols2, M2, params["w2"], mid_p, mid_p,
                            in_scale=s1, in_bias=b1,
                            gamma=params.get("g2"), beta=params.get("be2"))

    # conv3: 1x1 stride 1, consuming BN2+ReLU(y2) via the fused prologue
    if y2.shape[0] != M2:
        y2 = y2[:M2]
    y3, s3, b3 = _run_conv(y2, M2, params["w3"], mid_p, out_p,
                           in_scale=s2v, in_bias=b2,
                           gamma=params.get("g3"), beta=params.get("be3"))

    # shortcut branch: 1x1 stride s (its BN is applied in the final epilogue)
    if "ws" in params:
        xs = x[:, ::s2, ::s2, :]
        colss = xs.reshape(N * xs.shape[1] * xs.shape[2], in_p)
        assert colss.shape[0] == M2
        ysc, ssc, bsc = _run_conv(colss, M2, params["ws"], in_p, out_p,
                                  gamma=params.get("gs"), beta=params.get("bes"))
    else:
        # identity shortcut (stride 1, in_c == out_c): no conv, no BN
        ysc = cols1
        ssc = jnp.ones((1, out_p), jnp.float32)
        bsc = jnp.zeros((1, out_p), jnp.float32)

    # fused epilogue: BN3(main) + BNsc(shortcut) + residual add + final ReLU
    if y3.shape[0] != M2:
        y3 = y3[:M2]
    if ysc.shape[0] != M2:
        ysc = ysc[:M2]
    out = _bn_add_relu(y3, s3, b3, ysc, ssc, bsc)

    out = out[:, :out_c].reshape(N, Ho, Wo, out_c)
    return jnp.transpose(out, (0, 3, 1, 2)).astype(jnp.float32)   # NHWC -> NCHW


def init_params(key, in_channels, out_channels):
    mid = out_channels // 4
    k1, k2, k3, k4 = jax.random.split(key, 4)
    s = 0.5
    return {
        "w1": s * jax.random.normal(k1, (mid, in_channels, 1, 1), jnp.float32),
        "w2": s * jax.random.normal(k2, (mid, mid, 3, 3), jnp.float32),
        "w3": s * jax.random.normal(k3, (out_channels, mid, 1, 1), jnp.float32),
        "ws": s * jax.random.normal(k4, (out_channels, in_channels, 1, 1),
                                    jnp.float32),
    }


if __name__ == "__main__":
    key = jax.random.PRNGKey(0)
    kx, kp = jax.random.split(key)

    in_channels, out_channels = 4, 8
    x = jax.random.normal(kx, (2, in_channels, 16, 16), jnp.float32)   # NCHW
    params = init_params(kp, in_channels, out_channels)

    fwd = jax.jit(functools.partial(bottleneck_forward, downsample=True))
    out = jax.block_until_ready(fwd(x, params))

    assert out.shape == (2, out_channels, 8, 8), out.shape
    assert bool(jnp.all(out >= 0.0))           # final ReLU
    assert bool(jnp.all(jnp.isfinite(out)))
    print("KERNEL_OK")
</pallas_src>

<mosaic_0001>
module attributes {stable_mosaic.version = 11 : i64} {
  func.func @_mm_stats_kernel(%arg0: i32, %arg1: i32, %arg2: i32, %arg3: memref<256x128xbf16, #tpu.memory_space<vmem>>, %arg4: memref<128x128xbf16, #tpu.memory_space<vmem>>, %arg5: memref<256x128xbf16, #tpu.memory_space<vmem>>, %arg6: memref<8x128xf32, #tpu.memory_space<vmem>>, %arg7: memref<256x128xf32, #tpu.memory_space<vmem>>) attributes {dimension_semantics = [#tpu.dimension_semantics<parallel>, #tpu.dimension_semantics<parallel>, #tpu.dimension_semantics<arbitrary>], iteration_bounds = array<i64: 2, 1, 1>, scalar_prefetch = 0 : i64, scratch_operands = 1 : i64, tpu.core_type = #tpu.core_type<tc>, window_params = [{transform_indices = @transform_0, window_bounds = array<i64: 256, 128>}, {transform_indices = @transform_1, window_bounds = array<i64: 128, 128>}, {transform_indices = @transform_2, window_bounds = array<i64: 256, 128>}, {transform_indices = @transform_3, window_bounds = array<i64: 8, 128>}]} {
    %c0_i32 = arith.constant 0 : i32
    %0 = arith.cmpi eq, %arg2, %c0_i32 : i32
    %1 = arith.extui %0 : i1 to i32
    %c0_i32_0 = arith.constant 0 : i32
    %2 = arith.cmpi ne, %1, %c0_i32_0 : i32
    scf.if %2 {
      %cst_10 = arith.constant 0.000000e+00 : f32
      %12 = vector.broadcast %cst_10 : f32 to vector<256x128xf32>
      %c0_11 = arith.constant 0 : index
      %c0_12 = arith.constant 0 : index
      %13 = vector.load %arg7[%c0_11, %c0_12] : memref<256x128xf32, #tpu.memory_space<vmem>>, vector<256x128xf32>
      tpu.vector_store %arg7[%c0_11, %c0_12], %12 {strides = array<i32>} : memref<256x128xf32, #tpu.memory_space<vmem>>, vector<256x128xf32>,
    } else {
    }
    %c0 = arith.constant 0 : index
    %c0_1 = arith.constant 0 : index
    %3 = vector.load %arg3[%c0, %c0_1] : memref<256x128xbf16, #tpu.memory_space<vmem>>, vector<256x128xbf16>
    %c0_2 = arith.constant 0 : index
    %c0_3 = arith.constant 0 : index
    %4 = vector.load %arg7[%c0_2, %c0_3] : memref<256x128xf32, #tpu.memory_space<vmem>>, vector<256x128xf32>
    %c0_4 = arith.constant 0 : index
    %c0_5 = arith.constant 0 : index
    %5 = vector.load %arg4[%c0_4, %c0_5] : memref<128x128xbf16, #tpu.memory_space<vmem>>, vector<128x128xbf16>
    %cst = arith.constant dense<0.000000e+00> : vector<256x128xf32>
    %6 = tpu.matmul %3, %5, %cst {dimension_numbers = #tpu.dot_dimension_numbers<[1], [0], [0], [1], [0, 0, 1, 1], [], []>} : vector<256x128xbf16>, vector<128x128xbf16>, vector<256x128xf32> -> vector<256x128xf32>
    %7 = arith.addf %4, %6 : vector<256x128xf32>
    %c0_6 = arith.constant 0 : index
    %c0_7 = arith.constant 0 : index
    %8 = vector.load %arg7[%c0_6, %c0_7] : memref<256x128xf32, #tpu.memory_space<vmem>>, vector<256x128xf32>
    tpu.vector_store %arg7[%c0_6, %c0_7], %7 {strides = array<i32>} : memref<256x128xf32, #tpu.memory_space<vmem>>, vector<256x128xf32>,
    %c0_i32_8 = arith.constant 0 : i32
    %9 = arith.cmpi eq, %arg2, %c0_i32_8 : i32
    %10 = arith.extui %9 : i1 to i32
    %c0_i32_9 = arith.constant 0 : i32
    %11 = arith.cmpi ne, %10, %c0_i32_9 : i32
    scf.if %11 {
      %c0_10 = arith.constant 0 : index
      %c0_11 = arith.constant 0 : index
      %12 = vector.load %arg7[%c0_10, %c0_11] : memref<256x128xf32, #tpu.memory_space<vmem>>, vector<256x128xf32>
      %13 = arith.truncf %12 : vector<256x128xf32> to vector<256x128xbf16>
      %c0_12 = arith.constant 0 : index
      %c0_13 = arith.constant 0 : index
      %14 = vector.load %arg5[%c0_12, %c0_13] : memref<256x128xbf16, #tpu.memory_space<vmem>>, vector<256x128xbf16>
      tpu.vector_store %arg5[%c0_12, %c0_13], %13 {strides = array<i32>} : memref<256x128xbf16, #tpu.memory_space<vmem>>, vector<256x128xbf16>,
      %cst_14 = arith.constant dense<0.000000e+00> : vector<128xf32>
      %15 = vector.multi_reduction <add>, %12, %cst_14 [0] : vector<256x128xf32> to vector<128xf32>
      %16 = vector.shape_cast %15 : vector<128xf32> to vector<1x128xf32>
      %c0_15 = arith.constant 0 : index
      %c0_16 = arith.constant 0 : index
      %17 = vector.load %arg6[%c0_15, %c0_16] : memref<8x128xf32, #tpu.memory_space<vmem>>, vector<1x128xf32>
      tpu.vector_store %arg6[%c0_15, %c0_16], %16 {strides = array<i32>} : memref<8x128xf32, #tpu.memory_space<vmem>>, vector<1x128xf32>,
      %18 = arith.mulf %12, %12 : vector<256x128xf32>
      %cst_17 = arith.constant dense<0.000000e+00> : vector<128xf32>
      %19 = vector.multi_reduction <add>, %18, %cst_17 [0] : vector<256x128xf32> to vector<128xf32>
      %20 = vector.shape_cast %19 : vector<128xf32> to vector<1x128xf32>
      %c1 = arith.constant 1 : index
      %c0_18 = arith.constant 0 : index
      %21 = vector.load %arg6[%c1, %c0_18] : memref<8x128xf32, #tpu.memory_space<vmem>>, vector<1x128xf32>
      tpu.vector_store %arg6[%c1, %c0_18], %20 {strides = array<i32>} : memref<8x128xf32, #tpu.memory_space<vmem>>, vector<1x128xf32>,
    } else {
    }
    return
  }
  func.func @transform_0(%arg0: i32, %arg1: i32, %arg2: i32) -> (i32, i32) {
    %c0_i32 = arith.constant 0 : i32
    return %arg0, %arg2 : i32, i32
  }
  func.func @transform_1(%arg0: i32, %arg1: i32, %arg2: i32) -> (i32, i32) {
    %c0_i32 = arith.constant 0 : i32
    return %arg2, %arg1 : i32, i32
  }
  func.func @transform_2(%arg0: i32, %arg1: i32, %arg2: i32) -> (i32, i32) {
    %c0_i32 = arith.constant 0 : i32
    return %arg0, %arg1 : i32, i32
  }
  func.func @transform_3(%arg0: i32, %arg1: i32, %arg2: i32) -> (i32, i32) {
    %c0_i32 = arith.constant 0 : i32
    return %arg0, %arg1 : i32, i32
  }
}

module attributes {stable_mosaic.version = 11 : i64} {
  func.func @_mm_stats_kernel(%arg0: i32, %arg1: i32, %arg2: i32, %arg3: memref<64x1152xbf16, #tpu.memory_space<vmem>>, %arg4: memref<1x1152xf32, #tpu.memory_space<vmem>>, %arg5: memref<1x1152xf32, #tpu.memory_space<vmem>>, %arg6: memref<1152x128xbf16, #tpu.memory_space<vmem>>, %arg7: memref<64x128xbf16, #tpu.memory_space<vmem>>, %arg8: memref<8x128xf32, #tpu.memory_space<vmem>>, %arg9: memref<64x128xf32, #tpu.memory_space<vmem>>) attributes {dimension_semantics = [#tpu.dimension_semantics<parallel>, #tpu.dimension_semantics<parallel>, #tpu.dimension_semantics<arbitrary>], iteration_bounds = array<i64: 2, 1, 1>, scalar_prefetch = 0 : i64, scratch_operands = 1 : i64, tpu.core_type = #tpu.core_type<tc>, window_params = [{transform_indices = @transform_0, window_bounds = array<i64: 64, 1152>}, {transform_indices = @transform_1, window_bounds = array<i64: 1, 1152>}, {transform_indices = @transform_2, window_bounds = array<i64: 1, 1152>}, {transform_indices = @transform_3, window_bounds = array<i64: 1152, 128>}, {transform_indices = @transform_4, window_bounds = array<i64: 64, 128>}, {transform_indices = @transform_5, window_bounds = array<i64: 8, 128>}]} {
    %c0_i32 = arith.constant 0 : i32
    %0 = arith.cmpi eq, %arg2, %c0_i32 : i32
    %1 = arith.extui %0 : i1 to i32
    %c0_i32_0 = arith.constant 0 : i32
    %2 = arith.cmpi ne, %1, %c0_i32_0 : i32
    scf.if %2 {
      %cst_15 = arith.constant 0.000000e+00 : f32
      %22 = vector.broadcast %cst_15 : f32 to vector<64x128xf32>
      %c0_16 = arith.constant 0 : index
      %c0_17 = arith.constant 0 : index
      %23 = vector.load %arg9[%c0_16, %c0_17] : memref<64x128xf32, #tpu.memory_space<vmem>>, vector<64x128xf32>
      tpu.vector_store %arg9[%c0_16, %c0_17], %22 {strides = array<i32>} : memref<64x128xf32, #tpu.memory_space<vmem>>, vector<64x128xf32>,
    } else {
    }
    %c0 = arith.constant 0 : index
    %c0_1 = arith.constant 0 : index
    %3 = vector.load %arg3[%c0, %c0_1] : memref<64x1152xbf16, #tpu.memory_space<vmem>>, vector<64x1152xbf16>
    %4 = arith.extf %3 : vector<64x1152xbf16> to vector<64x1152xf32>
    %c0_2 = arith.constant 0 : index
    %c0_3 = arith.constant 0 : index
    %5 = vector.load %arg4[%c0_2, %c0_3] : memref<1x1152xf32, #tpu.memory_space<vmem>>, vector<1x1152xf32>
    %6 = vector.broadcast %5 : vector<1x1152xf32> to vector<64x1152xf32>
    %7 = arith.mulf %4, %6 : vector<64x1152xf32>
    %c0_4 = arith.constant 0 : index
    %c0_5 = arith.constant 0 : index
    %8 = vector.load %arg5[%c0_4, %c0_5] : memref<1x1152xf32, #tpu.memory_space<vmem>>, vector<1x1152xf32>
    %9 = vector.broadcast %8 : vector<1x1152xf32> to vector<64x1152xf32>
    %10 = arith.addf %7, %9 : vector<64x1152xf32>
    %cst = arith.constant 0.000000e+00 : f32
    %11 = vector.broadcast %cst : f32 to vector<64x1152xf32>
    %12 = arith.maximumf %10, %11 : vector<64x1152xf32>
    %13 = arith.truncf %12 : vector<64x1152xf32> to vector<64x1152xbf16>
    %c0_6 = arith.constant 0 : index
    %c0_7 = arith.constant 0 : index
    %14 = vector.load %arg9[%c0_6, %c0_7] : memref<64x128xf32, #tpu.memory_space<vmem>>, vector<64x128xf32>
    %c0_8 = arith.constant 0 : index
    %c0_9 = arith.constant 0 : index
    %15 = vector.load %arg6[%c0_8, %c0_9] : memref<1152x128xbf16, #tpu.memory_space<vmem>>, vector<1152x128xbf16>
    %cst_10 = arith.constant dense<0.000000e+00> : vector<64x128xf32>
    %16 = tpu.matmul %13, %15, %cst_10 {dimension_numbers = #tpu.dot_dimension_numbers<[1], [0], [0], [1], [0, 0, 1, 1], [], []>} : vector<64x1152xbf16>, vector<1152x128xbf16>, vector<64x128xf32> -> vector<64x128xf32>
    %17 = arith.addf %14, %16 : vector<64x128xf32>
    %c0_11 = arith.constant 0 : index
    %c0_12 = arith.constant 0 : index
    %18 = vector.load %arg9[%c0_11, %c0_12] : memref<64x128xf32, #tpu.memory_space<vmem>>, vector<64x128xf32>
    tpu.vector_store %arg9[%c0_11, %c0_12], %17 {strides = array<i32>} : memref<64x128xf32, #tpu.memory_space<vmem>>, vector<64x128xf32>,
    %c0_i32_13 = arith.constant 0 : i32
    %19 = arith.cmpi eq, %arg2, %c0_i32_13 : i32
    %20 = arith.extui %19 : i1 to i32
    %c0_i32_14 = arith.constant 0 : i32
    %21 = arith.cmpi ne, %20, %c0_i32_14 : i32
    scf.if %21 {
      %c0_15 = arith.constant 0 : index
      %c0_16 = arith.constant 0 : index
      %22 = vector.load %arg9[%c0_15, %c0_16] : memref<64x128xf32, #tpu.memory_space<vmem>>, vector<64x128xf32>
      %23 = arith.truncf %22 : vector<64x128xf32> to vector<64x128xbf16>
      %c0_17 = arith.constant 0 : index
      %c0_18 = arith.constant 0 : index
      %24 = vector.load %arg7[%c0_17, %c0_18] : memref<64x128xbf16, #tpu.memory_space<vmem>>, vector<64x128xbf16>
      tpu.vector_store %arg7[%c0_17, %c0_18], %23 {strides = array<i32>} : memref<64x128xbf16, #tpu.memory_space<vmem>>, vector<64x128xbf16>,
      %cst_19 = arith.constant dense<0.000000e+00> : vector<128xf32>
      %25 = vector.multi_reduction <add>, %22, %cst_19 [0] : vector<64x128xf32> to vector<128xf32>
      %26 = vector.shape_cast %25 : vector<128xf32> to vector<1x128xf32>
      %c0_20 = arith.constant 0 : index
      %c0_21 = arith.constant 0 : index
      %27 = vector.load %arg8[%c0_20, %c0_21] : memref<8x128xf32, #tpu.memory_space<vmem>>, vector<1x128xf32>
      tpu.vector_store %arg8[%c0_20, %c0_21], %26 {strides = array<i32>} : memref<8x128xf32, #tpu.memory_space<vmem>>, vector<1x128xf32>,
      %28 = arith.mulf %22, %22 : vector<64x128xf32>
      %cst_22 = arith.constant dense<0.000000e+00> : vector<128xf32>
      %29 = vector.multi_reduction <add>, %28, %cst_22 [0] : vector<64x128xf32> to vector<128xf32>
      %30 = vector.shape_cast %29 : vector<128xf32> to vector<1x128xf32>
      %c1 = arith.constant 1 : index
      %c0_23 = arith.constant 0 : index
      %31 = vector.load %arg8[%c1, %c0_23] : memref<8x128xf32, #tpu.memory_space<vmem>>, vector<1x128xf32>
      tpu.vector_store %arg8[%c1, %c0_23], %30 {strides = array<i32>} : memref<8x128xf32, #tpu.memory_space<vmem>>, vector<1x128xf32>,
    } else {
    }
    return
  }
  func.func @transform_0(%arg0: i32, %arg1: i32, %arg2: i32) -> (i32, i32) {
    %c0_i32 = arith.constant 0 : i32
    return %arg0, %arg2 : i32, i32
  }
  func.func @transform_1(%arg0: i32, %arg1: i32, %arg2: i32) -> (i32, i32) {
    %c0_i32 = arith.constant 0 : i32
    %c0_i32_0 = arith.constant 0 : i32
    return %c0_i32, %arg2 : i32, i32
  }
  func.func @transform_2(%arg0: i32, %arg1: i32, %arg2: i32) -> (i32, i32) {
    %c0_i32 = arith.constant 0 : i32
    %c0_i32_0 = arith.constant 0 : i32
    return %c0_i32, %arg2 : i32, i32
  }
  func.func @transform_3(%arg0: i32, %arg1: i32, %arg2: i32) -> (i32, i32) {
    %c0_i32 = arith.constant 0 : i32
    return %arg2, %arg1 : i32, i32
  }
  func.func @transform_4(%arg0: i32, %arg1: i32, %arg2: i32) -> (i32, i32) {
    %c0_i32 = arith.constant 0 : i32
    return %arg0, %arg1 : i32, i32
  }
  func.func @transform_5(%arg0: i32, %arg1: i32, %arg2: i32) -> (i32, i32) {
    %c0_i32 = arith.constant 0 : i32
    return %arg0, %arg1 : i32, i32
  }
}

module attributes {stable_mosaic.version = 11 : i64} {
  func.func @_mm_stats_kernel(%arg0: i32, %arg1: i32, %arg2: i32, %arg3: memref<64x128xbf16, #tpu.memory_space<vmem>>, %arg4: memref<1x128xf32, #tpu.memory_space<vmem>>, %arg5: memref<1x128xf32, #tpu.memory_space<vmem>>, %arg6: memref<128x128xbf16, #tpu.memory_space<vmem>>, %arg7: memref<64x128xbf16, #tpu.memory_space<vmem>>, %arg8: memref<8x128xf32, #tpu.memory_space<vmem>>, %arg9: memref<64x128xf32, #tpu.memory_space<vmem>>) attributes {dimension_semantics = [#tpu.dimension_semantics<parallel>, #tpu.dimension_semantics<parallel>, #tpu.dimension_semantics<arbitrary>], iteration_bounds = array<i64: 2, 1, 1>, scalar_prefetch = 0 : i64, scratch_operands = 1 : i64, tpu.core_type = #tpu.core_type<tc>, window_params = [{transform_indices = @transform_0, window_bounds = array<i64: 64, 128>}, {transform_indices = @transform_1, window_bounds = array<i64: 1, 128>}, {transform_indices = @transform_2, window_bounds = array<i64: 1, 128>}, {transform_indices = @transform_3, window_bounds = array<i64: 128, 128>}, {transform_indices = @transform_4, window_bounds = array<i64: 64, 128>}, {transform_indices = @transform_5, window_bounds = array<i64: 8, 128>}]} {
    %c0_i32 = arith.constant 0 : i32
    %0 = arith.cmpi eq, %arg2, %c0_i32 : i32
    %1 = arith.extui %0 : i1 to i32
    %c0_i32_0 = arith.constant 0 : i32
    %2 = arith.cmpi ne, %1, %c0_i32_0 : i32
    scf.if %2 {
      %cst_15 = arith.constant 0.000000e+00 : f32
      %22 = vector.broadcast %cst_15 : f32 to vector<64x128xf32>
      %c0_16 = arith.constant 0 : index
      %c0_17 = arith.constant 0 : index
      %23 = vector.load %arg9[%c0_16, %c0_17] : memref<64x128xf32, #tpu.memory_space<vmem>>, vector<64x128xf32>
      tpu.vector_store %arg9[%c0_16, %c0_17], %22 {strides = array<i32>} : memref<64x128xf32, #tpu.memory_space<vmem>>, vector<64x128xf32>,
    } else {
    }
    %c0 = arith.constant 0 : index
    %c0_1 = arith.constant 0 : index
    %3 = vector.load %arg3[%c0, %c0_1] : memref<64x128xbf16, #tpu.memory_space<vmem>>, vector<64x128xbf16>
    %4 = arith.extf %3 : vector<64x128xbf16> to vector<64x128xf32>
    %c0_2 = arith.constant 0 : index
    %c0_3 = arith.constant 0 : index
    %5 = vector.load %arg4[%c0_2, %c0_3] : memref<1x128xf32, #tpu.memory_space<vmem>>, vector<1x128xf32>
    %6 = vector.broadcast %5 : vector<1x128xf32> to vector<64x128xf32>
    %7 = arith.mulf %4, %6 : vector<64x128xf32>
    %c0_4 = arith.constant 0 : index
    %c0_5 = arith.constant 0 : index
    %8 = vector.load %arg5[%c0_4, %c0_5] : memref<1x128xf32, #tpu.memory_space<vmem>>, vector<1x128xf32>
    %9 = vector.broadcast %8 : vector<1x128xf32> to vector<64x128xf32>
    %10 = arith.addf %7, %9 : vector<64x128xf32>
    %cst = arith.constant 0.000000e+00 : f32
    %11 = vector.broadcast %cst : f32 to vector<64x128xf32>
    %12 = arith.maximumf %10, %11 : vector<64x128xf32>
    %13 = arith.truncf %12 : vector<64x128xf32> to vector<64x128xbf16>
    %c0_6 = arith.constant 0 : index
    %c0_7 = arith.constant 0 : index
    %14 = vector.load %arg9[%c0_6, %c0_7] : memref<64x128xf32, #tpu.memory_space<vmem>>, vector<64x128xf32>
    %c0_8 = arith.constant 0 : index
    %c0_9 = arith.constant 0 : index
    %15 = vector.load %arg6[%c0_8, %c0_9] : memref<128x128xbf16, #tpu.memory_space<vmem>>, vector<128x128xbf16>
    %cst_10 = arith.constant dense<0.000000e+00> : vector<64x128xf32>
    %16 = tpu.matmul %13, %15, %cst_10 {dimension_numbers = #tpu.dot_dimension_numbers<[1], [0], [0], [1], [0, 0, 1, 1], [], []>} : vector<64x128xbf16>, vector<128x128xbf16>, vector<64x128xf32> -> vector<64x128xf32>
    %17 = arith.addf %14, %16 : vector<64x128xf32>
    %c0_11 = arith.constant 0 : index
    %c0_12 = arith.constant 0 : index
    %18 = vector.load %arg9[%c0_11, %c0_12] : memref<64x128xf32, #tpu.memory_space<vmem>>, vector<64x128xf32>
    tpu.vector_store %arg9[%c0_11, %c0_12], %17 {strides = array<i32>} : memref<64x128xf32, #tpu.memory_space<vmem>>, vector<64x128xf32>,
    %c0_i32_13 = arith.constant 0 : i32
    %19 = arith.cmpi eq, %arg2, %c0_i32_13 : i32
    %20 = arith.extui %19 : i1 to i32
    %c0_i32_14 = arith.constant 0 : i32
    %21 = arith.cmpi ne, %20, %c0_i32_14 : i32
    scf.if %21 {
      %c0_15 = arith.constant 0 : index
      %c0_16 = arith.constant 0 : index
      %22 = vector.load %arg9[%c0_15, %c0_16] : memref<64x128xf32, #tpu.memory_space<vmem>>, vector<64x128xf32>
      %23 = arith.truncf %22 : vector<64x128xf32> to vector<64x128xbf16>
      %c0_17 = arith.constant 0 : index
      %c0_18 = arith.constant 0 : index
      %24 = vector.load %arg7[%c0_17, %c0_18] : memref<64x128xbf16, #tpu.memory_space<vmem>>, vector<64x128xbf16>
      tpu.vector_store %arg7[%c0_17, %c0_18], %23 {strides = array<i32>} : memref<64x128xbf16, #tpu.memory_space<vmem>>, vector<64x128xbf16>,
      %cst_19 = arith.constant dense<0.000000e+00> : vector<128xf32>
      %25 = vector.multi_reduction <add>, %22, %cst_19 [0] : vector<64x128xf32> to vector<128xf32>
      %26 = vector.shape_cast %25 : vector<128xf32> to vector<1x128xf32>
      %c0_20 = arith.constant 0 : index
      %c0_21 = arith.constant 0 : index
      %27 = vector.load %arg8[%c0_20, %c0_21] : memref<8x128xf32, #tpu.memory_space<vmem>>, vector<1x128xf32>
      tpu.vector_store %arg8[%c0_20, %c0_21], %26 {strides = array<i32>} : memref<8x128xf32, #tpu.memory_space<vmem>>, vector<1x128xf32>,
      %28 = arith.mulf %22, %22 : vector<64x128xf32>
      %cst_22 = arith.constant dense<0.000000e+00> : vector<128xf32>
      %29 = vector.multi_reduction <add>, %28, %cst_22 [0] : vector<64x128xf32> to vector<128xf32>
      %30 = vector.shape_cast %29 : vector<128xf32> to vector<1x128xf32>
      %c1 = arith.constant 1 : index
      %c0_23 = arith.constant 0 : index
      %31 = vector.load %arg8[%c1, %c0_23] : memref<8x128xf32, #tpu.memory_space<vmem>>, vector<1x128xf32>
      tpu.vector_store %arg8[%c1, %c0_23], %30 {strides = array<i32>} : memref<8x128xf32, #tpu.memory_space<vmem>>, vector<1x128xf32>,
    } else {
    }
    return
  }
  func.func @transform_0(%arg0: i32, %arg1: i32, %arg2: i32) -> (i32, i32) {
    %c0_i32 = arith.constant 0 : i32
    return %arg0, %arg2 : i32, i32
  }
  func.func @transform_1(%arg0: i32, %arg1: i32, %arg2: i32) -> (i32, i32) {
    %c0_i32 = arith.constant 0 : i32
    %c0_i32_0 = arith.constant 0 : i32
    return %c0_i32, %arg2 : i32, i32
  }
  func.func @transform_2(%arg0: i32, %arg1: i32, %arg2: i32) -> (i32, i32) {
    %c0_i32 = arith.constant 0 : i32
    %c0_i32_0 = arith.constant 0 : i32
    return %c0_i32, %arg2 : i32, i32
  }
  func.func @transform_3(%arg0: i32, %arg1: i32, %arg2: i32) -> (i32, i32) {
    %c0_i32 = arith.constant 0 : i32
    return %arg2, %arg1 : i32, i32
  }
  func.func @transform_4(%arg0: i32, %arg1: i32, %arg2: i32) -> (i32, i32) {
    %c0_i32 = arith.constant 0 : i32
    return %arg0, %arg1 : i32, i32
  }
  func.func @transform_5(%arg0: i32, %arg1: i32, %arg2: i32) -> (i32, i32) {
    %c0_i32 = arith.constant 0 : i32
    return %arg0, %arg1 : i32, i32
  }
}

module attributes {stable_mosaic.version = 11 : i64} {
  func.func @_mm_stats_kernel(%arg0: i32, %arg1: i32, %arg2: i32, %arg3: memref<64x128xbf16, #tpu.memory_space<vmem>>, %arg4: memref<128x128xbf16, #tpu.memory_space<vmem>>, %arg5: memref<64x128xbf16, #tpu.memory_space<vmem>>, %arg6: memref<8x128xf32, #tpu.memory_space<vmem>>, %arg7: memref<64x128xf32, #tpu.memory_space<vmem>>) attributes {dimension_semantics = [#tpu.dimension_semantics<parallel>, #tpu.dimension_semantics<parallel>, #tpu.dimension_semantics<arbitrary>], iteration_bounds = array<i64: 2, 1, 1>, scalar_prefetch = 0 : i64, scratch_operands = 1 : i64, tpu.core_type = #tpu.core_type<tc>, window_params = [{transform_indices = @transform_0, window_bounds = array<i64: 64, 128>}, {transform_indices = @transform_1, window_bounds = array<i64: 128, 128>}, {transform_indices = @transform_2, window_bounds = array<i64: 64, 128>}, {transform_indices = @transform_3, window_bounds = array<i64: 8, 128>}]} {
    %c0_i32 = arith.constant 0 : i32
    %0 = arith.cmpi eq, %arg2, %c0_i32 : i32
    %1 = arith.extui %0 : i1 to i32
    %c0_i32_0 = arith.constant 0 : i32
    %2 = arith.cmpi ne, %1, %c0_i32_0 : i32
    scf.if %2 {
      %cst_10 = arith.constant 0.000000e+00 : f32
      %12 = vector.broadcast %cst_10 : f32 to vector<64x128xf32>
      %c0_11 = arith.constant 0 : index
      %c0_12 = arith.constant 0 : index
      %13 = vector.load %arg7[%c0_11, %c0_12] : memref<64x128xf32, #tpu.memory_space<vmem>>, vector<64x128xf32>
      tpu.vector_store %arg7[%c0_11, %c0_12], %12 {strides = array<i32>} : memref<64x128xf32, #tpu.memory_space<vmem>>, vector<64x128xf32>,
    } else {
    }
    %c0 = arith.constant 0 : index
    %c0_1 = arith.constant 0 : index
    %3 = vector.load %arg3[%c0, %c0_1] : memref<64x128xbf16, #tpu.memory_space<vmem>>, vector<64x128xbf16>
    %c0_2 = arith.constant 0 : index
    %c0_3 = arith.constant 0 : index
    %4 = vector.load %arg7[%c0_2, %c0_3] : memref<64x128xf32, #tpu.memory_space<vmem>>, vector<64x128xf32>
    %c0_4 = arith.constant 0 : index
    %c0_5 = arith.constant 0 : index
    %5 = vector.load %arg4[%c0_4, %c0_5] : memref<128x128xbf16, #tpu.memory_space<vmem>>, vector<128x128xbf16>
    %cst = arith.constant dense<0.000000e+00> : vector<64x128xf32>
    %6 = tpu.matmul %3, %5, %cst {dimension_numbers = #tpu.dot_dimension_numbers<[1], [0], [0], [1], [0, 0, 1, 1], [], []>} : vector<64x128xbf16>, vector<128x128xbf16>, vector<64x128xf32> -> vector<64x128xf32>
    %7 = arith.addf %4, %6 : vector<64x128xf32>
    %c0_6 = arith.constant 0 : index
    %c0_7 = arith.constant 0 : index
    %8 = vector.load %arg7[%c0_6, %c0_7] : memref<64x128xf32, #tpu.memory_space<vmem>>, vector<64x128xf32>
    tpu.vector_store %arg7[%c0_6, %c0_7], %7 {strides = array<i32>} : memref<64x128xf32, #tpu.memory_space<vmem>>, vector<64x128xf32>,
    %c0_i32_8 = arith.constant 0 : i32
    %9 = arith.cmpi eq, %arg2, %c0_i32_8 : i32
    %10 = arith.extui %9 : i1 to i32
    %c0_i32_9 = arith.constant 0 : i32
    %11 = arith.cmpi ne, %10, %c0_i32_9 : i32
    scf.if %11 {
      %c0_10 = arith.constant 0 : index
      %c0_11 = arith.constant 0 : index
      %12 = vector.load %arg7[%c0_10, %c0_11] : memref<64x128xf32, #tpu.memory_space<vmem>>, vector<64x128xf32>
      %13 = arith.truncf %12 : vector<64x128xf32> to vector<64x128xbf16>
      %c0_12 = arith.constant 0 : index
      %c0_13 = arith.constant 0 : index
      %14 = vector.load %arg5[%c0_12, %c0_13] : memref<64x128xbf16, #tpu.memory_space<vmem>>, vector<64x128xbf16>
      tpu.vector_store %arg5[%c0_12, %c0_13], %13 {strides = array<i32>} : memref<64x128xbf16, #tpu.memory_space<vmem>>, vector<64x128xbf16>,
      %cst_14 = arith.constant dense<0.000000e+00> : vector<128xf32>
      %15 = vector.multi_reduction <add>, %12, %cst_14 [0] : vector<64x128xf32> to vector<128xf32>
      %16 = vector.shape_cast %15 : vector<128xf32> to vector<1x128xf32>
      %c0_15 = arith.constant 0 : index
      %c0_16 = arith.constant 0 : index
      %17 = vector.load %arg6[%c0_15, %c0_16] : memref<8x128xf32, #tpu.memory_space<vmem>>, vector<1x128xf32>
      tpu.vector_store %arg6[%c0_15, %c0_16], %16 {strides = array<i32>} : memref<8x128xf32, #tpu.memory_space<vmem>>, vector<1x128xf32>,
      %18 = arith.mulf %12, %12 : vector<64x128xf32>
      %cst_17 = arith.constant dense<0.000000e+00> : vector<128xf32>
      %19 = vector.multi_reduction <add>, %18, %cst_17 [0] : vector<64x128xf32> to vector<128xf32>
      %20 = vector.shape_cast %19 : vector<128xf32> to vector<1x128xf32>
      %c1 = arith.constant 1 : index
      %c0_18 = arith.constant 0 : index
      %21 = vector.load %arg6[%c1, %c0_18] : memref<8x128xf32, #tpu.memory_space<vmem>>, vector<1x128xf32>
      tpu.vector_store %arg6[%c1, %c0_18], %20 {strides = array<i32>} : memref<8x128xf32, #tpu.memory_space<vmem>>, vector<1x128xf32>,
    } else {
    }
    return
  }
  func.func @transform_0(%arg0: i32, %arg1: i32, %arg2: i32) -> (i32, i32) {
    %c0_i32 = arith.constant 0 : i32
    return %arg0, %arg2 : i32, i32
  }
  func.func @transform_1(%arg0: i32, %arg1: i32, %arg2: i32) -> (i32, i32) {
    %c0_i32 = arith.constant 0 : i32
    return %arg2, %arg1 : i32, i32
  }
  func.func @transform_2(%arg0: i32, %arg1: i32, %arg2: i32) -> (i32, i32) {
    %c0_i32 = arith.constant 0 : i32
    return %arg0, %arg1 : i32, i32
  }
  func.func @transform_3(%arg0: i32, %arg1: i32, %arg2: i32) -> (i32, i32) {
    %c0_i32 = arith.constant 0 : i32
    return %arg0, %arg1 : i32, i32
  }
}

module attributes {stable_mosaic.version = 11 : i64} {
  func.func @_bn_add_relu_kernel(%arg0: i32, %arg1: memref<128x128xbf16, #tpu.memory_space<vmem>>, %arg2: memref<1x128xf32, #tpu.memory_space<vmem>>, %arg3: memref<1x128xf32, #tpu.memory_space<vmem>>, %arg4: memref<128x128xbf16, #tpu.memory_space<vmem>>, %arg5: memref<1x128xf32, #tpu.memory_space<vmem>>, %arg6: memref<1x128xf32, #tpu.memory_space<vmem>>, %arg7: memref<128x128xbf16, #tpu.memory_space<vmem>>) attributes {dimension_semantics = [#tpu.dimension_semantics<parallel>], iteration_bounds = array<i64: 1>, scalar_prefetch = 0 : i64, scratch_operands = 0 : i64, tpu.core_type = #tpu.core_type<tc>, window_params = [{transform_indices = @transform_0, window_bounds = array<i64: 128, 128>}, {pipeline_mode = #tpu.pipeline_mode<synchronous>, transform_indices = @transform_1, window_bounds = array<i64: 1, 128>}, {pipeline_mode = #tpu.pipeline_mode<synchronous>, transform_indices = @transform_2, window_bounds = array<i64: 1, 128>}, {transform_indices = @transform_3, window_bounds = array<i64: 128, 128>}, {pipeline_mode = #tpu.pipeline_mode<synchronous>, transform_indices = @transform_4, window_bounds = array<i64: 1, 128>}, {pipeline_mode = #tpu.pipeline_mode<synchronous>, transform_indices = @transform_5, window_bounds = array<i64: 1, 128>}, {transform_indices = @transform_6, window_bounds = array<i64: 128, 128>}]} {
    %c0 = arith.constant 0 : index
    %c0_0 = arith.constant 0 : index
    %0 = vector.load %arg1[%c0, %c0_0] : memref<128x128xbf16, #tpu.memory_space<vmem>>, vector<128x128xbf16>
    %1 = arith.extf %0 : vector<128x128xbf16> to vector<128x128xf32>
    %c0_1 = arith.constant 0 : index
    %c0_2 = arith.constant 0 : index
    %2 = vector.load %arg2[%c0_1, %c0_2] : memref<1x128xf32, #tpu.memory_space<vmem>>, vector<1x128xf32>
    %3 = vector.broadcast %2 : vector<1x128xf32> to vector<128x128xf32>
    %4 = arith.mulf %1, %3 : vector<128x128xf32>
    %c0_3 = arith.constant 0 : index
    %c0_4 = arith.constant 0 : index
    %5 = vector.load %arg3[%c0_3, %c0_4] : memref<1x128xf32, #tpu.memory_space<vmem>>, vector<1x128xf32>
    %6 = vector.broadcast %5 : vector<1x128xf32> to vector<128x128xf32>
    %7 = arith.addf %4, %6 : vector<128x128xf32>
    %c0_5 = arith.constant 0 : index
    %c0_6 = arith.constant 0 : index
    %8 = vector.load %arg4[%c0_5, %c0_6] : memref<128x128xbf16, #tpu.memory_space<vmem>>, vector<128x128xbf16>
    %9 = arith.extf %8 : vector<128x128xbf16> to vector<128x128xf32>
    %c0_7 = arith.constant 0 : index
    %c0_8 = arith.constant 0 : index
    %10 = vector.load %arg5[%c0_7, %c0_8] : memref<1x128xf32, #tpu.memory_space<vmem>>, vector<1x128xf32>
    %11 = vector.broadcast %10 : vector<1x128xf32> to vector<128x128xf32>
    %12 = arith.mulf %9, %11 : vector<128x128xf32>
    %c0_9 = arith.constant 0 : index
    %c0_10 = arith.constant 0 : index
    %13 = vector.load %arg6[%c0_9, %c0_10] : memref<1x128xf32, #tpu.memory_space<vmem>>, vector<1x128xf32>
    %14 = vector.broadcast %13 : vector<1x128xf32> to vector<128x128xf32>
    %15 = arith.addf %12, %14 : vector<128x128xf32>
    %16 = arith.addf %7, %15 : vector<128x128xf32>
    %cst = arith.constant 0.000000e+00 : f32
    %17 = vector.broadcast %cst : f32 to vector<128x128xf32>
    %18 = arith.maximumf %16, %17 : vector<128x128xf32>
    %19 = arith.truncf %18 : vector<128x128xf32> to vector<128x128xbf16>
    %c0_11 = arith.constant 0 : index
    %c0_12 = arith.constant 0 : index
    %20 = vector.load %arg7[%c0_11, %c0_12] : memref<128x128xbf16, #tpu.memory_space<vmem>>, vector<128x128xbf16>
    tpu.vector_store %arg7[%c0_11, %c0_12], %19 {strides = array<i32>} : memref<128x128xbf16, #tpu.memory_space<vmem>>, vector<128x128xbf16>,
    return
  }
  func.func @transform_0(%arg0: i32) -> (i32, i32) {
    %c0_i32 = arith.constant 0 : i32
    %c0_i32_0 = arith.constant 0 : i32
    return %arg0, %c0_i32 : i32, i32
  }
  func.func @transform_1(%arg0: i32) -> (i32, i32) {
    %c0_i32 = arith.constant 0 : i32
    %c0_i32_0 = arith.constant 0 : i32
    %c0_i32_1 = arith.constant 0 : i32
    return %c0_i32, %c0_i32_0 : i32, i32
  }
  func.func @transform_2(%arg0: i32) -> (i32, i32) {
    %c0_i32 = arith.constant 0 : i32
    %c0_i32_0 = arith.constant 0 : i32
    %c0_i32_1 = arith.constant 0 : i32
    return %c0_i32, %c0_i32_0 : i32, i32
  }
  func.func @transform_3(%arg0: i32) -> (i32, i32) {
    %c0_i32 = arith.constant 0 : i32
    %c0_i32_0 = arith.constant 0 : i32
    return %arg0, %c0_i32 : i32, i32
  }
  func.func @transform_4(%arg0: i32) -> (i32, i32) {
    %c0_i32 = arith.constant 0 : i32
    %c0_i32_0 = arith.constant 0 : i32
    %c0_i32_1 = arith.constant 0 : i32
    return %c0_i32, %c0_i32_0 : i32, i32
  }
  func.func @transform_5(%arg0: i32) -> (i32, i32) {
    %c0_i32 = arith.constant 0 : i32
    %c0_i32_0 = arith.constant 0 : i32
    %c0_i32_1 = arith.constant 0 : i32
    return %c0_i32, %c0_i32_0 : i32, i32
  }
  func.func @transform_6(%arg0: i32) -> (i32, i32) {
    %c0_i32 = arith.constant 0 : i32
    %c0_i32_0 = arith.constant 0 : i32
    return %arg0, %c0_i32 : i32, i32
  }
}

</mosaic_0001>

<bundles_post_ra>
// kernel: bottleneck_forward.5
= control target key start
LH: loop header
LB: loop body
LE: loop exit
PB: predicated region body
PF: predicated region fallthrough
CT: control target
= control target key end

     0   :  { %s1569_s12 = smov 0   ;;  %s1571_s13 = smov 0   ;;  %s1767_s0 = inlined_call_operand.vmem [shape: bf16[512,128], index: 0, kind: input, shape index: {}]   ;;  %s1768_s1 = inlined_call_operand.vmem [shape: bf16[128,128], index: 1, kind: input, shape index: {}]   ;;  %s1769_s2 = inlined_call_operand.vmem [shape: bf16[512,128], index: 2, kind: output, shape index: {0}]   ;;  %s1770_s3 = inlined_call_operand.vmem [shape: f32[16,128], index: 3, kind: output, shape index: {1}]  }
   0x1   :  { %s1573_s14 = smov 0  }
   0x2 LB: > { %s33_s15 = sadd.s32 1, %s1543_s13  ;;  %p1198_p0 = scmp.ge.s32.totalorder %s1547_s14, 1  ;;  %s1547_s14 = sphi %s1573_s14, %s14_s14   ;;  %s1543_s13 = sphi %s1571_s13, %s1772_s13   ;;  %s1539_s12 = sphi %s1569_s12, %s1771_s12  }
   0x3   : > { %p35_p1 = scmp.ge.s32.totalorder %s33_s15, 2  ;;  %p185_p2 = scmp.lt.s32.totalorder %s1547_s14, 3 }
   0x5   : > { %s1774_s15 = smov (%p35_p1, %s33_s15), 0  ;;  %p186_p3 = pnand %p1198_p0, %p185_p2 }
   0x6   : > { %s1199_s18 = sshll.u32 (!%p186_p3), %s1539_s12, 5  ;;  %p257_p5 = scmp.lt.s32.totalorder (!%p186_p3), %s1539_s12, 1 }
   0x7   : > { %189 = sbr.rel (%p186_p3) target bundleno = 321 (0x141), region = 28  ;;  %p231_p4 = scmp.lt.s32.totalorder (!%p186_p3), %s1199_s18, 63 }
   0xc   : > { %v1501_v0 = vld [vmem:[%s1768_s1 + $0x38] sm:$0xff]   ;;  %v1502_v1 = vld [vmem:[%s1768_s1 + $0x30] sm:$0xff]   ;;  %s1776_s18 = smov (!%p231_p4, %s1199_s18), 63  ;;  %v1503_v2 = vld [vmem:[%s1768_s1 + $0x28] sm:$0xff]   ;;  %s1778_s12 = smov (!%p257_p5, %s1539_s12), 1 }
   0xd   : > { %1413 = vmatprep.subr.bf16.mxu0 %v1501_v0  ;;  %1461 = vmatprep.subr.bf16.mxu1 %v1501_v0  ;;  %s1200_s23 = sshll.u32 %s1776_s18, 2  ;;  %v1504_v3 = vld [vmem:[%s1768_s1 + $0x20] sm:$0xff]   ;;  %v1505_v5 = vld [vmem:[%s1768_s1 + $0x18] sm:$0xff]   ;;  %v1506_v6 = vld [vmem:[%s1768_s1 + $0x10] sm:$0xff]   ;;  %s1203_s17 = sshll.u32 %s1778_s12, 3 }
   0xe   : > { %1414 = vmatpush3.bf16.msra.mxu0 %v1501_v0  ;;  %1469 = vmatpush3.bf16.msra.mxu1 %v1501_v0  ;;  %s1607_s26 = scalar_lea.vmem %s1767_s0, %s1200_s23  ;;  %v1507_v8 = vld [vmem:[%s1768_s1 + $0x8] sm:$0xff]   ;;  %v1508_v9 = vld [vmem:[%s1768_s1] sm:$0xff]   ;;  %s1649_s16 = scalar_lea.vmem %s1769_s2, %s1200_s23 }
   0xf   : > { %1415 = vmatprep.subr.bf16.mxu0 %v1502_v1  ;;  %1462 = vmatprep.subr.bf16.mxu1 %v1502_v1  ;;  %v1509_v4 = vld [vmem:[%s1607_s26] sm:$0xff]   ;;  %v1510_v10 = vld [vmem:[%s1607_s26 + $0x8] sm:$0xff]   ;;  %v1511_v12 = vld [vmem:[%s1607_s26 + $0x10] sm:$0xff]   ;;  %s263_s20 = scalar_lea.vmem %s1770_s3, %s1203_s17 }
  0x10   : > { %1429 = vmatprep.mubr.bf16.mxu0 %v1509_v4  ;;  %v1517_v7 = vld [vmem:[%s1607_s26 + $0x40] sm:$0xff]   ;;  %v1518_v11 = vld [vmem:[%s1607_s26 + $0x48] sm:$0xff]   ;;  %v1519_v13 = vld [vmem:[%s1607_s26 + $0x50] sm:$0xff]  }
  0x11   : > { %1445 = vmatprep.mubr.bf16.mxu1 %v1517_v7  ;;  %v1512_v14 = vld [vmem:[%s1607_s26 + $0x18] sm:$0xff]   ;;  %v1513_v16 = vld [vmem:[%s1607_s26 + $0x20] sm:$0xff]   ;;  %v1514_v18 = vld [vmem:[%s1607_s26 + $0x28] sm:$0xff]  }
  0x12   : > { %1416 = vmatpush3.bf16.msra.mxu0 %v1502_v1  ;;  %1470 = vmatpush3.bf16.msra.mxu1 %v1502_v1  ;;  %v1520_v15 = vld [vmem:[%s1607_s26 + $0x58] sm:$0xff]   ;;  %v1521_v17 = vld [vmem:[%s1607_s26 + $0x60] sm:$0xff]   ;;  %v1522_v19 = vld [vmem:[%s1607_s26 + $0x68] sm:$0xff]  }
  0x13   : > { %1417 = vmatprep.subr.bf16.mxu0 %v1503_v2  ;;  %1463 = vmatprep.subr.bf16.mxu1 %v1503_v2  ;;  %v1515_v20 = vld [vmem:[%s1607_s26 + $0x30] sm:$0xff]   ;;  %v1516_v22 = vld [vmem:[%s1607_s26 + $0x38] sm:$0xff]  }
  0x14   : > { %v1523_v21 = vld [vmem:[%s1607_s26 + $0x70] sm:$0xff]   ;;  %v1524_v23 = vld [vmem:[%s1607_s26 + $0x78] sm:$0xff]  }
  0x16   : > { %1418 = vmatpush3.bf16.msra.mxu0 %v1503_v2  ;;  %1471 = vmatpush3.bf16.msra.mxu1 %v1503_v2 }
  0x17   : > { %1419 = vmatprep.subr.bf16.mxu0 %v1504_v3  ;;  %1464 = vmatprep.subr.bf16.mxu1 %v1504_v3 }
  0x1a   : > { %1420 = vmatpush3.bf16.msra.mxu0 %v1504_v3  ;;  %1472 = vmatpush3.bf16.msra.mxu1 %v1504_v3 }
  0x1b   : > { %1421 = vmatprep.subr.bf16.mxu0 %v1505_v5  ;;  %1465 = vmatprep.subr.bf16.mxu1 %v1505_v5 }
  0x1e   : > { %1422 = vmatpush3.bf16.msra.mxu0 %v1505_v5  ;;  %1473 = vmatpush3.bf16.msra.mxu1 %v1505_v5 }
  0x1f   : > { %1423 = vmatprep.subr.bf16.mxu0 %v1506_v6  ;;  %1466 = vmatprep.subr.bf16.mxu1 %v1506_v6 }
  0x22   : > { %1424 = vmatpush3.bf16.msra.mxu0 %v1506_v6  ;;  %1474 = vmatpush3.bf16.msra.mxu1 %v1506_v6 }
  0x23   : > { %1425 = vmatprep.subr.bf16.mxu0 %v1507_v8  ;;  %1467 = vmatprep.subr.bf16.mxu1 %v1507_v8 }
  0x26   : > { %1426 = vmatpush3.bf16.msra.mxu0 %v1507_v8  ;;  %1475 = vmatpush3.bf16.msra.mxu1 %v1507_v8 }
  0x27   : > { %1427 = vmatprep.subr.bf16.mxu0 %v1508_v9  ;;  %1468 = vmatprep.subr.bf16.mxu1 %v1508_v9 }
  0x2a   : > { %1428 = vmatpush3.bf16.msra.mxu0 %v1508_v9  ;;  %1476 = vmatpush3.bf16.msra.mxu1 %v1508_v9 }
  0x2d   : > { %1430 = vmatmul.mubr.bf16.vlgmr.msra.gmra.mxu0 %v1510_v10  ;;  %1446 = vmatmul.mubr.bf16.vlgmr.msra.gmra.mxu1 %v1518_v11 }
  0x2e   : > { %1433 = vmatprep.mubr.bf16.mxu0 %v1511_v12  ;;  %1449 = vmatprep.mubr.bf16.mxu1 %v1519_v13 }
  0x35   : > { %1434 = vmatmul.mubr.bf16.gmra.mxu0 %v1512_v14  ;;  %1450 = vmatmul.mubr.bf16.gmra.mxu1 %v1520_v15 }
  0x36   : > { %1437 = vmatprep.mubr.bf16.mxu0 %v1513_v16  ;;  %1453 = vmatprep.mubr.bf16.mxu1 %v1521_v17 }
  0x3d   : > { %1438 = vmatmul.mubr.bf16.gmra.mxu0 %v1514_v18  ;;  %1454 = vmatmul.mubr.bf16.gmra.mxu1 %v1522_v19 }
  0x3e   : > { %1441 = vmatprep.mubr.bf16.mxu0 %v1515_v20  ;;  %1457 = vmatprep.mubr.bf16.mxu1 %v1523_v21 }
  0x45   : > { %1442 = vmatmul.mubr.bf16.gmra.mxu0 %v1516_v22  ;;  %1458 = vmatmul.mubr.bf16.gmra.mxu1 %v1524_v23 }
  0xed   : > { %v1431_v24 = vpop.f32.mrf.mxu0  ;;  %v1640_v25 = vpop.f32.mrf.mxu1 }
  0xee   : > { %v985_v41 = vmul.f32 %v1431_v24, %v1431_v24 }
  0xef   : > { %v559_v26 = vpop.f32.mrf.mxu0  ;;  %v1642_v27 = vpop.f32.mrf.mxu1 }
  0xf0   : > { %v983_v32 = vmul.f32 %v559_v26, %v559_v26 }
  0xf1   : > { %v1432_v28 = vpop.f32.mrf.mxu0  ;;  %v1651_v29 = vpop.f32.mrf.mxu1 }
  0xf2   : > { %v1302_v30 = vpack.c.bf16 %v1432_v28, %v1431_v24  ;;  %v1342_v31 = vpack.c.bf16 %v1651_v29, %v1640_v25  ;;  %v986_v46 = vmul.f32 %v1432_v28, %v1432_v28 }
  0xf3   : > { %v562_v33 = vpop.f32.mrf.mxu0  ;;  %v1655_v34 = vpop.f32.mrf.mxu1 }
  0xf4   : > { %1374 = vst [vmem:[%s1649_s16 + $0x8] sm:$0xff] %v1302_v30   ;;  %v1297_v35 = vpack.c.bf16 %v562_v33, %v559_v26  ;;  %v945_v36 = vadd.f32 %v562_v33, %v559_v26  ;;  %v984_v37 = vmul.f32 %v562_v33, %v562_v33  ;;  %1382 = vst [vmem:[%s1649_s16 + $0x48] sm:$0xff] %v1342_v31  }
  0xf5   : > { %v1337_v38 = vpack.c.bf16 %v1655_v34, %v1642_v27  ;;  %v1435_v39 = vpop.f32.mrf.mxu0  ;;  %v1661_v40 = vpop.f32.mrf.mxu1 }
  0xf6   : > { %1298 = vst [vmem:[%s1649_s16] sm:$0xff] %v1297_v35   ;;  %v946_v42 = vadd.f32 %v1431_v24, %v945_v36  ;;  %v1015_v43 = vadd.f32 %v984_v37, %v983_v32  ;;  %v989_v1 = vmul.f32 %v1435_v39, %v1435_v39 }
  0xf7   : > { %1381 = vst [vmem:[%s1649_s16 + $0x40] sm:$0xff] %v1337_v38   ;;  %v575_v44 = vpop.f32.mrf.mxu0  ;;  %v1665_v45 = vpop.f32.mrf.mxu1 }
  0xf8   : > { %v1016_v47 = vadd.f32 %v1015_v43, %v985_v41  ;;  %v947_v48 = vadd.f32 %v1432_v28, %v946_v42  ;;  %v987_v52 = vmul.f32 %v575_v44, %v575_v44 }
  0xf9   : > { %v1436_v49 = vpop.f32.mrf.mxu0  ;;  %v1667_v50 = vpop.f32.mrf.mxu1 }
  0xfa   : > { %v948_v51 = vadd.f32 %v947_v48, %v575_v44  ;;  %v1017_v53 = vadd.f32 %v1016_v47, %v986_v46  ;;  %v1312_v54 = vpack.c.bf16 %v1436_v49, %v1435_v39  ;;  %v1352_v56 = vpack.c.bf16 %v1667_v50, %v1661_v40 }
  0xfb   : > { %v578_v55 = vpop.f32.mrf.mxu0  ;;  %v1671_v57 = vpop.f32.mrf.mxu1  ;;  %v990_v6 = vmul.f32 %v1436_v49, %v1436_v49 }
  0xfc   : > { %v1018_v58 = vadd.f32 %v1017_v53, %v987_v52  ;;  %1376 = vst [vmem:[%s1649_s16 + $0x18] sm:$0xff] %v1312_v54   ;;  %v1307_v59 = vpack.c.bf16 %v578_v55, %v575_v44  ;;  %v949_v60 = vadd.f32 %v948_v51, %v578_v55  ;;  %v988_v61 = vmul.f32 %v578_v55, %v578_v55 }
  0xfd   : > { %v1439_v62 = vpop.f32.mrf.mxu0  ;;  %1384 = vst [vmem:[%s1649_s16 + $0x58] sm:$0xff] %v1352_v56   ;;  %v1347_v63 = vpack.c.bf16 %v1671_v57, %v1665_v45  ;;  %v1677_v0 = vpop.f32.mrf.mxu1 }
  0xfe   : > { %1375 = vst [vmem:[%s1649_s16 + $0x10] sm:$0xff] %v1307_v59   ;;  %v950_v2 = vadd.f32 %v1435_v39, %v949_v60  ;;  %v1019_v3 = vadd.f32 %v1018_v58, %v988_v61  ;;  %v993_v26 = vmul.f32 %v1439_v62, %v1439_v62  ;;  %v999_v61 = vmul.f32 %v1642_v27, %v1642_v27 }
  0xff   : > { %v591_v4 = vpop.f32.mrf.mxu0  ;;  %1383 = vst [vmem:[%s1649_s16 + $0x50] sm:$0xff] %v1347_v63   ;;  %v1681_v5 = vpop.f32.mrf.mxu1 }
 0x100   : > { %v1020_v7 = vadd.f32 %v1019_v3, %v989_v1  ;;  %v951_v8 = vadd.f32 %v1436_v49, %v950_v2  ;;  %v991_v12 = vmul.f32 %v591_v4, %v591_v4  ;;  %v1000_v2 = vmul.f32 %v1655_v34, %v1655_v34 }
 0x101   : > { %v1440_v9 = vpop.f32.mrf.mxu0  ;;  %v1683_v10 = vpop.f32.mrf.mxu1 }
 0x102   : > { %v952_v11 = vadd.f32 %v951_v8, %v591_v4  ;;  %v1021_v13 = vadd.f32 %v1020_v7, %v990_v6  ;;  %v1322_v14 = vpack.c.bf16 %v1440_v9, %v1439_v62  ;;  %v1362_v16 = vpack.c.bf16 %v1683_v10, %v1677_v0 }
 0x103   : > { %v594_v15 = vpop.f32.mrf.mxu0  ;;  %v1687_v17 = vpop.f32.mrf.mxu1  ;;  %v994_v33 = vmul.f32 %v1440_v9, %v1440_v9  ;;  %v1002_v8 = vmul.f32 %v1651_v29, %v1651_v29 }
 0x104   : > { %v1022_v18 = vadd.f32 %v1021_v13, %v991_v12  ;;  %1378 = vst [vmem:[%s1649_s16 + $0x28] sm:$0xff] %v1322_v14   ;;  %v1317_v19 = vpack.c.bf16 %v594_v15, %v591_v4  ;;  %v953_v20 = vadd.f32 %v952_v11, %v594_v15  ;;  %v992_v21 = vmul.f32 %v594_v15, %v594_v15 }
 0x105   : > { %v1443_v22 = vpop.f32.mrf.mxu0  ;;  %1386 = vst [vmem:[%s1649_s16 + $0x68] sm:$0xff] %v1362_v16   ;;  %v1357_v23 = vpack.c.bf16 %v1687_v17, %v1681_v5  ;;  %v1693_v24 = vpop.f32.mrf.mxu1  ;;  %v1001_v4 = vmul.f32 %v1640_v25, %v1640_v25  ;;  %v1003_v12 = vmul.f32 %v1665_v45, %v1665_v45  ;;  %v1004_v15 = vmul.f32 %v1671_v57, %v1671_v57 }
 0x106   : > { %1377 = vst [vmem:[%s1649_s16 + $0x20] sm:$0xff] %v1317_v19   ;;  %v954_v28 = vadd.f32 %v1439_v62, %v953_v20  ;;  %v1023_v30 = vadd.f32 %v1022_v18, %v992_v21  ;;  %v997_v54 = vmul.f32 %v1443_v22, %v1443_v22  ;;  %v1007_v21 = vmul.f32 %v1681_v5, %v1681_v5 }
 0x107   : > { %v607_v31 = vpop.f32.mrf.mxu0  ;;  %1385 = vst [vmem:[%s1649_s16 + $0x60] sm:$0xff] %v1357_v23   ;;  %v1697_v32 = vpop.f32.mrf.mxu1 }
 0x108   : > { %v1024_v35 = vadd.f32 %v1023_v30, %v993_v26  ;;  %v955_v36 = vadd.f32 %v1440_v9, %v954_v28  ;;  %v995_v41 = vmul.f32 %v607_v31, %v607_v31  ;;  %v1008_v26 = vmul.f32 %v1687_v17, %v1687_v17 }
 0x109   : > { %v1444_v37 = vpop.f32.mrf.mxu0  ;;  %v1699_v38 = vpop.f32.mrf.mxu1 }
 0x10a   : > { %v956_v39 = vadd.f32 %v955_v36, %v607_v31  ;;  %v1025_v42 = vadd.f32 %v1024_v35, %v994_v33  ;;  %v1332_v43 = vpack.c.bf16 %v1444_v37, %v1443_v22  ;;  %v1372_v46 = vpack.c.bf16 %v1699_v38, %v1693_v24 }
 0x10b   : > { %v610_v44 = vpop.f32.mrf.mxu0  ;;  %v674_v47 = vpop.f32.mrf.mxu1  ;;  %v998_v58 = vmul.f32 %v1444_v37, %v1444_v37  ;;  %v1011_v35 = vmul.f32 %v1697_v32, %v1697_v32 }
 0x10c   : > { %v1026_v48 = vadd.f32 %v1025_v42, %v995_v41  ;;  %1380 = vst [vmem:[%s1649_s16 + $0x38] sm:$0xff] %v1332_v43   ;;  %v1327_v49 = vpack.c.bf16 %v610_v44, %v607_v31  ;;  %v957_v51 = vadd.f32 %v956_v39, %v610_v44  ;;  %v996_v52 = vmul.f32 %v610_v44, %v610_v44 }
 0x10d   : > { %1388 = vst [vmem:[%s1649_s16 + $0x78] sm:$0xff] %v1372_v46   ;;  %v1367_v53 = vpack.c.bf16 %v674_v47, %v1697_v32  ;;  %v1012_v39 = vmul.f32 %v674_v47, %v674_v47  ;;  %v1014_v43 = vmul.f32 %v1699_v38, %v1699_v38 }
 0x10e   : > { %1379 = vst [vmem:[%s1649_s16 + $0x30] sm:$0xff] %v1327_v49   ;;  %v958_v55 = vadd.f32 %v1443_v22, %v957_v51  ;;  %v1027_v56 = vadd.f32 %v1026_v48, %v996_v52 }
 0x10f   : > { %1387 = vst [vmem:[%s1649_s16 + $0x70] sm:$0xff] %v1367_v53  }
 0x110   : > { %v959_v59 = vadd.f32 %v1444_v37, %v958_v55  ;;  %v1028_v60 = vadd.f32 %v1027_v56, %v997_v54 }
 0x112   : > { %v1029_v62 = vadd.f32 %v1028_v60, %v998_v58  ;;  %v960_v63 = vadd.f32 %v959_v59, %v1642_v27 }
 0x114   : > { %v961_v1 = vadd.f32 %v960_v63, %v1655_v34  ;;  %v1030_v3 = vadd.f32 %v1029_v62, %v999_v61 }
 0x116   : > { %v962_v6 = vadd.f32 %v1640_v25, %v961_v1  ;;  %v1031_v7 = vadd.f32 %v1030_v3, %v1000_v2  ;;  %v1005_v25 = vmul.f32 %v1661_v40, %v1661_v40 }
 0x118   : > { %v1032_v9 = vadd.f32 %v1031_v7, %v1001_v4  ;;  %v963_v11 = vadd.f32 %v1651_v29, %v962_v6  ;;  %v1006_v29 = vmul.f32 %v1667_v50, %v1667_v50 }
 0x11a   : > { %v964_v27 = vadd.f32 %v963_v11, %v1665_v45  ;;  %v1033_v13 = vadd.f32 %v1032_v9, %v1002_v8 }
 0x11c   : > { %v1034_v34 = vadd.f32 %v1033_v13, %v1003_v12  ;;  %v965_v14 = vadd.f32 %v964_v27, %v1671_v57 }
 0x11e   : > { %v966_v16 = vadd.f32 %v1661_v40, %v965_v14  ;;  %v1035_v18 = vadd.f32 %v1034_v34, %v1004_v15  ;;  %v1009_v40 = vmul.f32 %v1677_v0, %v1677_v0 }
 0x120   : > { %v1036_v19 = vadd.f32 %v1035_v18, %v1005_v25  ;;  %v967_v20 = vadd.f32 %v1667_v50, %v966_v16  ;;  %v1010_v50 = vmul.f32 %v1683_v10, %v1683_v10 }
 0x122   : > { %v968_v45 = vadd.f32 %v967_v20, %v1681_v5  ;;  %v1037_v22 = vadd.f32 %v1036_v19, %v1006_v29 }
 0x124   : > { %v1038_v23 = vadd.f32 %v1037_v22, %v1007_v21  ;;  %v969_v57 = vadd.f32 %v968_v45, %v1687_v17 }
 0x126   : > { %v970_v28 = vadd.f32 %v1677_v0, %v969_v57  ;;  %v1039_v30 = vadd.f32 %v1038_v23, %v1008_v26  ;;  %v1013_v0 = vmul.f32 %v1693_v24, %v1693_v24 }
 0x128   : > { %v1040_v31 = vadd.f32 %v1039_v30, %v1009_v40  ;;  %v971_v5 = vadd.f32 %v1683_v10, %v970_v28 }
 0x12a   : > { %v972_v33 = vadd.f32 %v971_v5, %v1697_v32  ;;  %v1041_v17 = vadd.f32 %v1040_v31, %v1010_v50 }
 0x12c   : > { %v1042_v36 = vadd.f32 %v1041_v17, %v1011_v35  ;;  %v973_v37 = vadd.f32 %v972_v33, %v674_v47 }
 0x12e   : > { %v974_v41 = vadd.f32 %v1693_v24, %v973_v37  ;;  %v1043_v42 = vadd.f32 %v1042_v36, %v1012_v39 }
 0x130   : > { %v975_v10 = vadd.f32 %v1699_v38, %v974_v41  ;;  %v1044_v44 = vadd.f32 %v1043_v42, %v1013_v0 }
 0x132   : > { %v976_v46 = vrot.slane %v975_v10, 4  ;;  %v1045_v48 = vadd.f32 %v1044_v44, %v1014_v43 }
 0x134   : > { %v977_v32 = vadd.f32 %v976_v46, %v975_v10  ;;  %v1046_v49 = vrot.slane %v1045_v48, 4 }
 0x136   : > { %v978_v51 = vrot.slane %v977_v32, 2  ;;  %v1047_v47 = vadd.f32 %v1046_v49, %v1045_v48 }
 0x138   : > { %v979_v52 = vadd.f32 %v978_v51, %v977_v32  ;;  %v1048_v53 = vrot.slane %v1047_v47, 2 }
 0x13a   : > { %v980_v54 = vrot.slane %v979_v52, 1  ;;  %v1049_v24 = vadd.f32 %v1048_v53, %v1047_v47 }
 0x13c   : > { %v981_v55 = vadd.f32 %v980_v54, %v979_v52  ;;  %v1050_v56 = vrot.slane %v1049_v24, 1 }
 0x13e   : > { %982 = vst [vmem:[%s263_s20] sm:$0x1] %v981_v55  ;;  %v1051_v38 = vadd.f32 %v1050_v56, %v1049_v24 }
 0x140   : > { %1052 = vst [vmem:[%s263_s20 + $0x1] sm:$0x1] %v1051_v38 }
 0x141 PF: > { %s14_s14 = sadd.s32 1, %s1547_s14   ;;  %s1771_s12 = smov %s1543_s13 }
 0x142   : > { %p11_p6 = scmp.ge.s32.totalorder %s14_s14, 4   ;;  %s1772_s13 = smov %s1774_s15 }
 0x144   :  { %13 = sbr.rel (!%p11_p6) target bundleno = 2 (0x2), region = 81 }

// kernel: bottleneck_forward.7
= control target key start
LH: loop header
LB: loop body
LE: loop exit
PB: predicated region body
PF: predicated region fallthrough
CT: control target
= control target key end

     0   :  { %s1042_s18 = smov 0   ;;  %s1044_s19 = smov 0   ;;  %s1120_s0 = inlined_call_operand.vmem [shape: bf16[128,128], index: 0, kind: input, shape index: {}]   ;;  %s1121_s1 = inlined_call_operand.vmem [shape: f32[1,128], index: 1, kind: input, shape index: {}]   ;;  %s1122_s2 = inlined_call_operand.vmem [shape: f32[1,128], index: 2, kind: input, shape index: {}]   ;;  %s1123_s3 = inlined_call_operand.vmem [shape: bf16[128,128], index: 3, kind: input, shape index: {}]   ;;  %s1124_s4 = inlined_call_operand.vmem [shape: bf16[128,128], index: 4, kind: output, shape index: {0}]   ;;  %s1125_s5 = inlined_call_operand.vmem [shape: f32[16,128], index: 5, kind: output, shape index: {1}]  }
   0x1   :  { %s1046_s20 = smov 0  }
   0x2 LB: > { %s35_s21 = sadd.s32 1, %s1006_s19  ;;  %p828_p0 = scmp.ge.s32.totalorder %s1010_s20, 1  ;;  %s1010_s20 = sphi %s1046_s20, %s16_s20   ;;  %s1006_s19 = sphi %s1044_s19, %s1127_s19   ;;  %s1002_s18 = sphi %s1042_s18, %s1126_s18  }
   0x3   : > { %p37_p1 = scmp.ge.s32.totalorder %s35_s21, 2  ;;  %p251_p2 = scmp.lt.s32.totalorder %s1010_s20, 3 }
   0x5   : > { %s1129_s21 = smov (%p37_p1, %s35_s21), 0  ;;  %p252_p3 = pnand %p828_p0, %p251_p2 }
   0x6   : > { %s829_s24 = sshll.u32 (!%p252_p3), %s1002_s18, 3  ;;  %p339_p5 = scmp.lt.s32.totalorder (!%p252_p3), %s1002_s18, 1 }
   0x7   : > { %255 = sbr.rel (%p252_p3) target bundleno = 273 (0x111), region = 36  ;;  %p307_p4 = scmp.lt.s32.totalorder (!%p252_p3), %s829_s24, 15 }
   0xc   : > { %v980_v0 = vld [vmem:[%s1123_s3 + $0x38] sm:$0xff]   ;;  %v981_v1 = vld [vmem:[%s1123_s3 + $0x30] sm:$0xff]   ;;  %s1131_s24 = smov (!%p307_p4, %s829_s24), 15  ;;  %v982_v2 = vld [vmem:[%s1123_s3 + $0x28] sm:$0xff]   ;;  %s1133_s18 = smov (!%p339_p5, %s1002_s18), 1 }
   0xd   : > { %916 = vmatprep.subr.bf16.mxu0 %v980_v0  ;;  %940 = vmatprep.subr.bf16.mxu1 %v980_v0  ;;  %s830_s29 = sshll.u32 %s1131_s24, 2  ;;  %v983_v3 = vld [vmem:[%s1123_s3 + $0x20] sm:$0xff]   ;;  %v984_v16 = vld [vmem:[%s1123_s3 + $0x18] sm:$0xff]   ;;  %v985_v29 = vld [vmem:[%s1123_s3 + $0x10] sm:$0xff]   ;;  %s833_s24 = sshll.u32 %s1133_s18, 3 }
   0xe   : > { %917 = vmatpush3.bf16.msra.mxu0 %v980_v0  ;;  %948 = vmatpush3.bf16.msra.mxu1 %v980_v0  ;;  %s313_s7 = scalar_lea.vmem %s1120_s0, %s830_s29  ;;  %v834_v5 = vld [vmem:[%s1121_s1] ss:$0 sm:$0xff]  ;;  %v986_v38 = vld [vmem:[%s1123_s3 + $0x8] sm:$0xff]   ;;  %s337_s30 = scalar_lea.vmem %s1124_s4, %s830_s29 }
   0xf   : > { %918 = vmatprep.subr.bf16.mxu0 %v981_v1  ;;  %941 = vmatprep.subr.bf16.mxu1 %v981_v1  ;;  %v863_v4 = vld [vmem:[%s313_s7] sm:$0xff]   ;;  %v899_v8 = vld [vmem:[%s313_s7 + $0x10] sm:$0xff]   ;;  %v898_v10 = vld [vmem:[%s313_s7 + $0x8] sm:$0xff]  }
  0x10   : > { %v864_v6 = vunpack.c.l.bf16 %v863_v4  ;;  %v865_v7 = vunpack.c.h.bf16 %v863_v4  ;;  %v835_v9 = vld [vmem:[%s1122_s2] ss:$0 sm:$0xff]  ;;  %v872_v11 = vunpack.c.l.bf16 %v899_v8  ;;  %v873_v12 = vunpack.c.h.bf16 %v899_v8  ;;  %v900_v15 = vld [vmem:[%s313_s7 + $0x18] sm:$0xff]   ;;  %s345_s7 = scalar_lea.vmem %s1125_s5, %s833_s24 }
  0x11   : > { %v868_v20 = vunpack.c.l.bf16 %v898_v10  ;;  %v869_v22 = vunpack.c.h.bf16 %v898_v10  ;;  %v876_v24 = vunpack.c.l.bf16 %v900_v15  ;;  %v877_v25 = vunpack.c.h.bf16 %v900_v15  ;;  %v987_v43 = vld [vmem:[%s1123_s3] sm:$0xff]  }
  0x12   : > { %919 = vmatpush3.bf16.msra.mxu0 %v981_v1  ;;  %949 = vmatpush3.bf16.msra.mxu1 %v981_v1  ;;  %v382_v13 = vmul.f32 %v864_v6, %v834_v5  ;;  %v383_v14 = vmul.f32 %v865_v7, %v834_v5  ;;  %v386_v17 = vmul.f32 %v872_v11, %v834_v5 }
  0x13   : > { %920 = vmatprep.subr.bf16.mxu0 %v982_v2  ;;  %942 = vmatprep.subr.bf16.mxu1 %v982_v2  ;;  %v387_v21 = vmul.f32 %v873_v12, %v834_v5  ;;  %v384_v33 = vmul.f32 %v868_v20, %v834_v5  ;;  %v385_v34 = vmul.f32 %v869_v22, %v834_v5 }
  0x14   : > { %v397_v18 = vadd.f32 %v835_v9, %v382_v13  ;;  %v398_v19 = vadd.f32 %v835_v9, %v383_v14  ;;  %v401_v23 = vadd.f32 %v835_v9, %v386_v17  ;;  %v388_v35 = vmul.f32 %v876_v24, %v834_v5 }
  0x15   : > { %v402_v28 = vadd.f32 %v835_v9, %v387_v21  ;;  %v389_v36 = vmul.f32 %v877_v25, %v834_v5  ;;  %v399_v39 = vadd.f32 %v835_v9, %v384_v33  ;;  %v400_v40 = vadd.f32 %v835_v9, %v385_v34 }
  0x16   : > { %921 = vmatpush3.bf16.msra.mxu0 %v982_v2  ;;  %950 = vmatpush3.bf16.msra.mxu1 %v982_v2  ;;  %v405_v26 = vmax.f32 %v397_v18, 0.0  ;;  %v406_v27 = vmax.f32 %v398_v19, 0.0  ;;  %v409_v30 = vmax.f32 %v401_v23, 0.0  ;;  %v403_v41 = vadd.f32 %v835_v9, %v388_v35 }
  0x17   : > { %922 = vmatprep.subr.bf16.mxu0 %v983_v3  ;;  %943 = vmatprep.subr.bf16.mxu1 %v983_v3  ;;  %v410_v32 = vmax.f32 %v402_v28, 0.0  ;;  %v404_v42 = vadd.f32 %v835_v9, %v389_v36  ;;  %v407_v44 = vmax.f32 %v399_v39, 0.0  ;;  %v408_v45 = vmax.f32 %v400_v40, 0.0 }
  0x18   : > { %v413_v31 = vpack.c.bf16 %v406_v27, %v405_v26  ;;  %v411_v46 = vmax.f32 %v403_v41, 0.0 }
  0x19   : > { %v415_v37 = vpack.c.bf16 %v410_v32, %v409_v30  ;;  %v412_v47 = vmax.f32 %v404_v42, 0.0  ;;  %v414_v48 = vpack.c.bf16 %v408_v45, %v407_v44 }
  0x1a   : > { %923 = vmatpush3.bf16.msra.mxu0 %v983_v3  ;;  %951 = vmatpush3.bf16.msra.mxu1 %v983_v3 }
  0x1b   : > { %924 = vmatprep.subr.bf16.mxu0 %v984_v16  ;;  %944 = vmatprep.subr.bf16.mxu1 %v984_v16  ;;  %v416_v49 = vpack.c.bf16 %v412_v47, %v411_v46 }
  0x1c   : > { %932 = vmatprep.mubr.bf16.mxu0 %v413_v31  ;;  %936 = vmatprep.mubr.bf16.mxu1 %v415_v37 }
  0x1e   : > { %925 = vmatpush3.bf16.msra.mxu0 %v984_v16  ;;  %952 = vmatpush3.bf16.msra.mxu1 %v984_v16 }
  0x1f   : > { %926 = vmatprep.subr.bf16.mxu0 %v985_v29  ;;  %945 = vmatprep.subr.bf16.mxu1 %v985_v29 }
  0x22   : > { %927 = vmatpush3.bf16.msra.mxu0 %v985_v29  ;;  %953 = vmatpush3.bf16.msra.mxu1 %v985_v29 }
  0x23   : > { %928 = vmatprep.subr.bf16.mxu0 %v986_v38  ;;  %946 = vmatprep.subr.bf16.mxu1 %v986_v38 }
  0x26   : > { %929 = vmatpush3.bf16.msra.mxu0 %v986_v38  ;;  %954 = vmatpush3.bf16.msra.mxu1 %v986_v38 }
  0x27   : > { %930 = vmatprep.subr.bf16.mxu0 %v987_v43  ;;  %947 = vmatprep.subr.bf16.mxu1 %v987_v43 }
  0x2a   : > { %931 = vmatpush3.bf16.msra.mxu0 %v987_v43  ;;  %955 = vmatpush3.bf16.msra.mxu1 %v987_v43 }
  0x2d   : > { %933 = vmatmul.mubr.bf16.vlgmr.msra.gmra.mxu0 %v414_v48  ;;  %937 = vmatmul.mubr.bf16.vlgmr.msra.gmra.mxu1 %v416_v49 }
  0xed   : > { %v934_v50 = vpop.f32.mrf.mxu0  ;;  %v938_v51 = vpop.f32.mrf.mxu1 }
  0xee   : > { %v637_v1 = vmul.f32 %v934_v50, %v934_v50  ;;  %v641_v13 = vmul.f32 %v938_v51, %v938_v51 }
  0xef   : > { %v523_v52 = vpop.f32.mrf.mxu0  ;;  %v539_v53 = vpop.f32.mrf.mxu1 }
  0xf0   : > { %v635_v58 = vmul.f32 %v523_v52, %v523_v52  ;;  %v639_v7 = vmul.f32 %v539_v53, %v539_v53 }
  0xf1   : > { %v935_v54 = vpop.f32.mrf.mxu0  ;;  %v939_v55 = vpop.f32.mrf.mxu1 }
  0xf2   : > { %v886_v56 = vpack.c.bf16 %v935_v54, %v934_v50  ;;  %v896_v57 = vpack.c.bf16 %v939_v55, %v938_v51  ;;  %v638_v4 = vmul.f32 %v935_v54, %v935_v54  ;;  %v642_v16 = vmul.f32 %v939_v55, %v939_v55 }
  0xf3   : > { %v526_v59 = vpop.f32.mrf.mxu0  ;;  %v542_v60 = vpop.f32.mrf.mxu1 }
  0xf4   : > { %901 = vst [vmem:[%s337_s30 + $0x8] sm:$0xff] %v886_v56   ;;  %v881_v61 = vpack.c.bf16 %v526_v59, %v523_v52  ;;  %v621_v62 = vadd.f32 %v526_v59, %v523_v52  ;;  %v636_v63 = vmul.f32 %v526_v59, %v526_v59  ;;  %903 = vst [vmem:[%s337_s30 + $0x18] sm:$0xff] %v896_v57  }
  0xf5   : > { %v891_v0 = vpack.c.bf16 %v542_v60, %v539_v53  ;;  %v640_v11 = vmul.f32 %v542_v60, %v542_v60 }
  0xf6   : > { %882 = vst [vmem:[%s337_s30] sm:$0xff] %v881_v61   ;;  %v622_v2 = vadd.f32 %v934_v50, %v621_v62  ;;  %v643_v3 = vadd.f32 %v636_v63, %v635_v58 }
  0xf7   : > { %902 = vst [vmem:[%s337_s30 + $0x10] sm:$0xff] %v891_v0  }
  0xf8   : > { %v644_v5 = vadd.f32 %v643_v3, %v637_v1  ;;  %v623_v6 = vadd.f32 %v935_v54, %v622_v2 }
  0xfa   : > { %v624_v8 = vadd.f32 %v623_v6, %v539_v53  ;;  %v645_v9 = vadd.f32 %v644_v5, %v638_v4 }
  0xfc   : > { %v625_v10 = vadd.f32 %v624_v8, %v542_v60  ;;  %v646_v12 = vadd.f32 %v645_v9, %v639_v7 }
  0xfe   : > { %v626_v14 = vadd.f32 %v938_v51, %v625_v10  ;;  %v647_v15 = vadd.f32 %v646_v12, %v640_v11 }
 0x100   : > { %v627_v17 = vadd.f32 %v939_v55, %v626_v14  ;;  %v648_v18 = vadd.f32 %v647_v15, %v641_v13 }
 0x102   : > { %v628_v19 = vrot.slane %v627_v17, 4  ;;  %v649_v20 = vadd.f32 %v648_v18, %v642_v16 }
 0x104   : > { %v629_v21 = vadd.f32 %v628_v19, %v627_v17  ;;  %v650_v22 = vrot.slane %v649_v20, 4 }
 0x106   : > { %v630_v23 = vrot.slane %v629_v21, 2  ;;  %v651_v24 = vadd.f32 %v650_v22, %v649_v20 }
 0x108   : > { %v631_v25 = vadd.f32 %v630_v23, %v629_v21  ;;  %v652_v26 = vrot.slane %v651_v24, 2 }
 0x10a   : > { %v632_v27 = vrot.slane %v631_v25, 1  ;;  %v653_v28 = vadd.f32 %v652_v26, %v651_v24 }
 0x10c   : > { %v633_v29 = vadd.f32 %v632_v27, %v631_v25  ;;  %v654_v30 = vrot.slane %v653_v28, 1 }
 0x10e   : > { %634 = vst [vmem:[%s345_s7] sm:$0x1] %v633_v29  ;;  %v655_v31 = vadd.f32 %v654_v30, %v653_v28 }
 0x110   : > { %656 = vst [vmem:[%s345_s7 + $0x1] sm:$0x1] %v655_v31 }
 0x111 PF: > { %s16_s20 = sadd.s32 1, %s1010_s20   ;;  %s1126_s18 = smov %s1006_s19 }
 0x112   : > { %p13_p6 = scmp.ge.s32.totalorder %s16_s20, 4   ;;  %s1127_s19 = smov %s1129_s21 }
 0x114   :  { %15 = sbr.rel (!%p13_p6) target bundleno = 2 (0x2), region = 95 }

// kernel: bottleneck_forward.6
= control target key start
LH: loop header
LB: loop body
LE: loop exit
PB: predicated region body
PF: predicated region fallthrough
CT: control target
= control target key end

     0   :  { %s2509_s18 = smov 0   ;;  %s2511_s19 = smov 0   ;;  %s3051_s0 = inlined_call_operand.vmem [shape: bf16[128,1152], index: 0, kind: input, shape index: {}]   ;;  %s3052_s1 = inlined_call_operand.vmem [shape: f32[1,1152], index: 1, kind: input, shape index: {}]   ;;  %s3053_s2 = inlined_call_operand.vmem [shape: f32[1,1152], index: 2, kind: input, shape index: {}]   ;;  %s3054_s3 = inlined_call_operand.vmem [shape: bf16[1152,128], index: 3, kind: input, shape index: {}]   ;;  %s3055_s4 = inlined_call_operand.vmem [shape: bf16[128,128], index: 4, kind: output, shape index: {0}]   ;;  %s3056_s5 = inlined_call_operand.vmem [shape: f32[16,128], index: 5, kind: output, shape index: {1}]  }
   0x1   :  { %s2513_s20 = smov 0  }
   0x2 LB: > { %s35_s21 = sadd.s32 1, %s2473_s19  ;;  %p2025_p0 = scmp.ge.s32.totalorder %s2477_s20, 1  ;;  %s2477_s20 = sphi %s2513_s20, %s16_s20   ;;  %s2473_s19 = sphi %s2511_s19, %s3068_s19   ;;  %s2469_s18 = sphi %s2509_s18, %s3067_s18  }
   0x3   : > { %p37_p1 = scmp.ge.s32.totalorder %s35_s21, 2  ;;  %p258_p2 = scmp.lt.s32.totalorder %s2477_s20, 3 }
   0x5   : > { %s3070_s21 = smov (%p37_p1, %s35_s21), 0  ;;  %p259_p3 = pnand %p2025_p0, %p258_p2 }
   0x7   : > { %262 = sbr.rel (%p259_p3) target bundleno = 348 (0x15c), region = 36 }
   0xc   : > { %v2383_v0 = vld [vmem:[%s3054_s3 + $0x78] sm:$0xff]   ;;  %v2387_v4 = vld [vmem:[%s3054_s3 + $0x70] sm:$0xff]   ;;  %v2391_v8 = vld [vmem:[%s3054_s3 + $0x68] sm:$0xff]   ;;  %s2026_s6 = sshll.u32 %s2469_s18, 3  ;;  %v493_v21 = vlaneseq  ;;  %p357_p5 = scmp.lt.s32.totalorder %s2469_s18, 1 }
   0xd   : > { %v2384_v1 = vld [vmem:[%s3054_s3 + $0xf8] sm:$0xff]   ;;  %2146 = vmatprep.subr.bf16.mxu0 %v2383_v0  ;;  %v2388_v5 = vld [vmem:[%s3054_s3 + $0xf0] sm:$0xff]   ;;  %v2392_v9 = vld [vmem:[%s3054_s3 + $0xe8] sm:$0xff]   ;;  %p319_p4 = scmp.lt.s32.totalorder %s2026_s6, 15 }
   0xe   : > { %v2385_v2 = vld [vmem:[%s3054_s3 + $0x38] sm:$0xff]   ;;  %2186 = vmatprep.subr.bf16.mxu1 %v2384_v1  ;;  %v2389_v6 = vld [vmem:[%s3054_s3 + $0x30] sm:$0xff]   ;;  %v2393_v10 = vld [vmem:[%s3054_s3 + $0x28] sm:$0xff]   ;;  %v2607_v26 = vshrl.u32 %v493_v21, 7  ;;  %s3074_s18 = smov (!%p357_p5, %s2469_s18), 1 }
   0xf   : > { %v2386_v3 = vld [vmem:[%s3054_s3 + $0xb8] sm:$0xff]   ;;  %2147 = vmatpush3.bf16.msra.mxu0 %v2385_v2  ;;  %v2390_v7 = vld [vmem:[%s3054_s3 + $0xb0] sm:$0xff]   ;;  %v2394_v11 = vld [vmem:[%s3054_s3 + $0xa8] sm:$0xff]   ;;  %s3072_s6 = smov (!%p319_p4, %s2026_s6), 15 }
  0x10   : > { %2187 = vmatpush3.bf16.msra.mxu1 %v2386_v3  ;;  %2148 = vmatprep.subr.bf16.mxu0 %v2387_v4  ;;  %v2395_v12 = vld [vmem:[%s3054_s3 + $0x60] sm:$0xff]   ;;  %v2399_v16 = vld [vmem:[%s3054_s3 + $0x58] sm:$0xff]   ;;  %v2403_v20 = vld [vmem:[%s3054_s3 + $0x50] sm:$0xff]   ;;  %s2358_s9 = smul.u32 36, %s3072_s6  ;;  %v499_v32 = vsub.s32 1, %v2607_v26  ;;  %v507_v34 = vsub.s32 3, %v2607_v26 }
  0x11   : > { %2188 = vmatprep.subr.bf16.mxu1 %v2388_v5  ;;  %v2396_v13 = vld [vmem:[%s3054_s3 + $0xe0] sm:$0xff]   ;;  %v2400_v17 = vld [vmem:[%s3054_s3 + $0xd8] sm:$0xff]   ;;  %v2404_v22 = vld [vmem:[%s3054_s3 + $0xd0] sm:$0xff]   ;;  %v495_v36 = vsub.s32 0, %v2607_v26  ;;  %v503_v40 = vsub.s32 2, %v2607_v26  ;;  %v511_v41 = vsub.s32 4, %v2607_v26 }
  0x12   : > { %v2397_v14 = vld [vmem:[%s3054_s3 + $0x20] sm:$0xff]   ;;  %v2401_v18 = vld [vmem:[%s3054_s3 + $0x18] sm:$0xff]   ;;  %v2405_v23 = vld [vmem:[%s3054_s3 + $0x10] sm:$0xff]   ;;  %s2628_s24 = scalar_lea.vmem %s3051_s0, %s2358_s9  ;;  %v515_v42 = vsub.s32 5, %v2607_v26 }
  0x13   : > { %2149 = vmatpush3.bf16.msra.mxu0 %v2389_v6  ;;  %v2398_v15 = vld [vmem:[%s3054_s3 + $0xa0] sm:$0xff]   ;;  %v2402_v19 = vld [vmem:[%s3054_s3 + $0x98] sm:$0xff]   ;;  %v2406_v24 = vld [vmem:[%s3054_s3 + $0x90] sm:$0xff]  }
  0x14   : > { %2189 = vmatpush3.bf16.msra.mxu1 %v2390_v7  ;;  %2150 = vmatprep.subr.bf16.mxu0 %v2391_v8  ;;  %v2407_v25 = vld [vmem:[%s3054_s3 + $0x48] sm:$0xff]   ;;  %v2411_v30 = vld [vmem:[%s3054_s3 + $0x40] sm:$0xff]   ;;  %v2415_v54 = vld [vmem:[%s3054_s3 + $0x178] sm:$0xff]  }
  0x15   : > { %2190 = vmatprep.subr.bf16.mxu1 %v2392_v9  ;;  %v2408_v27 = vld [vmem:[%s3054_s3 + $0xc8] sm:$0xff]   ;;  %v2412_v31 = vld [vmem:[%s3054_s3 + $0xc0] sm:$0xff]   ;;  %v2416_v59 = vld [vmem:[%s3054_s3 + $0x1f8] sm:$0xff]  }
  0x16   : > { %v2409_v28 = vld [vmem:[%s3054_s3 + $0x8] sm:$0xff]   ;;  %v2413_v33 = vld [vmem:[%s3054_s3] sm:$0xff]  }
  0x17   : > { %2151 = vmatpush3.bf16.msra.mxu0 %v2393_v10  ;;  %v2410_v29 = vld [vmem:[%s3054_s3 + $0x88] sm:$0xff]   ;;  %v2414_v35 = vld [vmem:[%s3054_s3 + $0x80] sm:$0xff]  }
  0x18   : > { %2191 = vmatpush3.bf16.msra.mxu1 %v2394_v11  ;;  %2152 = vmatprep.subr.bf16.mxu0 %v2395_v12  ;;  %v377_v37 = vld [vmem:[%s2628_s24] sm:$0xff]  ;;  %v378_v48 = vld [vmem:[%s2628_s24 + $0x8] sm:$0xff] }
  0x19   : > { %2192 = vmatprep.subr.bf16.mxu1 %v2396_v13  ;;  %v382_v38 = vld [vmem:[%s2628_s24 + $0x24] sm:$0xff]  ;;  %v417_v43 = vunpack.c.l.bf16 %v377_v37  ;;  %v418_v44 = vunpack.c.h.bf16 %v377_v37  ;;  %v383_v49 = vld [vmem:[%s2628_s24 + $0x2c] sm:$0xff]  ;;  %v419_v52 = vunpack.c.l.bf16 %v378_v48  ;;  %v420_v53 = vunpack.c.h.bf16 %v378_v48 }
  0x1a   : > { %v2644_v39 = vld [vmem:[%s3052_s1] sm:$0xff]  ;;  %v426_v45 = vunpack.c.l.bf16 %v382_v38  ;;  %v427_v46 = vunpack.c.h.bf16 %v382_v38  ;;  %v428_v55 = vunpack.c.l.bf16 %v383_v49  ;;  %v429_v56 = vunpack.c.h.bf16 %v383_v49  ;;  %v2421_v49 = vld [vmem:[%s3054_s3 + $0x130] sm:$0xff]  }
  0x1b   : > { %2153 = vmatpush3.bf16.msra.mxu0 %v2397_v14  ;;  %v2652_v47 = vld [vmem:[%s3053_s2] sm:$0xff]  ;;  %v2657_v50 = vrot.slane %v2644_v39, %v499_v32  ;;  %v2666_v57 = vrot.slane %v2644_v39, %v507_v34  ;;  %v2677_v62 = vrot.slane %v2644_v39, %v495_v36  ;;  %v2685_v2 = vrot.slane %v2644_v39, %v503_v40 }
  0x1c   : > { %2193 = vmatpush3.bf16.msra.mxu1 %v2398_v15  ;;  %2154 = vmatprep.subr.bf16.mxu0 %v2399_v16  ;;  %v2660_v51 = vrot.slane %v2652_v47, %v499_v32  ;;  %v2669_v58 = vrot.slane %v2652_v47, %v507_v34  ;;  %v2680_v63 = vrot.slane %v2652_v47, %v495_v36  ;;  %v393_v34 = vld [vmem:[%s2628_s24 + $0x74] sm:$0xff] }
  0x1d   : > { %2194 = vmatprep.subr.bf16.mxu1 %v2400_v17  ;;  %v539_v60 = vmul.f32 %v2657_v50, %v418_v44  ;;  %v548_v61 = vmul.f32 %v2657_v50, %v427_v46  ;;  %v541_v0 = vmul.f32 %v2666_v57, %v420_v53  ;;  %v550_v1 = vmul.f32 %v2666_v57, %v429_v56  ;;  %v2419_v36 = vld [vmem:[%s3054_s3 + $0x170] sm:$0xff]  }
  0x1e   : > { %v2688_v3 = vrot.slane %v2652_v47, %v503_v40  ;;  %v538_v6 = vmul.f32 %v2677_v62, %v417_v43  ;;  %v547_v7 = vmul.f32 %v2677_v62, %v426_v45  ;;  %v540_v10 = vmul.f32 %v2685_v2, %v419_v52  ;;  %v2420_v44 = vld [vmem:[%s3054_s3 + $0x1f0] sm:$0xff]  }
  0x1f   : > { %2155 = vmatpush3.bf16.msra.mxu0 %v2401_v18  ;;  %v660_v4 = vadd.f32 %v2660_v51, %v539_v60  ;;  %v669_v5 = vadd.f32 %v2660_v51, %v548_v61  ;;  %v662_v8 = vadd.f32 %v2669_v58, %v541_v0  ;;  %v671_v9 = vadd.f32 %v2669_v58, %v550_v1  ;;  %v2422_v56 = vld [vmem:[%s3054_s3 + $0x1b0] sm:$0xff]  }
  0x20   : > { %2195 = vmatpush3.bf16.msra.mxu1 %v2402_v19  ;;  %2156 = vmatprep.subr.bf16.mxu0 %v2403_v20  ;;  %v549_v11 = vmul.f32 %v2685_v2, %v428_v55  ;;  %v659_v14 = vadd.f32 %v2680_v63, %v538_v6  ;;  %v668_v15 = vadd.f32 %v2680_v63, %v547_v7  ;;  %v2417_v20 = vld [vmem:[%s3054_s3 + $0x138] sm:$0xff]   ;;  %v447_v40 = vunpack.c.h.bf16 %v393_v34  ;;  %v2423_v6 = vld [vmem:[%s3054_s3 + $0x168] sm:$0xff]  }
  0x21   : > { %2196 = vmatprep.subr.bf16.mxu1 %v2404_v22  ;;  %v732_v12 = vmax.f32 %v660_v4, 0.0  ;;  %v741_v13 = vmax.f32 %v669_v5, 0.0  ;;  %v734_v16 = vmax.f32 %v662_v8, 0.0  ;;  %v743_v17 = vmax.f32 %v671_v9, 0.0 }
  0x22   : > { %v661_v18 = vadd.f32 %v2688_v3, %v540_v10  ;;  %v670_v19 = vadd.f32 %v2688_v3, %v549_v11  ;;  %v731_v22 = vmax.f32 %v659_v14, 0.0  ;;  %v446_v0 = vunpack.c.l.bf16 %v393_v34  ;;  %v2424_v11 = vld [vmem:[%s3054_s3 + $0x1e8] sm:$0xff]  }
  0x23   : > { %2157 = vmatpush3.bf16.msra.mxu0 %v2405_v23  ;;  %v804_v21 = vpack.c.bf16 %v741_v13, %v732_v12  ;;  %v740_v23 = vmax.f32 %v668_v15, 0.0 }
  0x24   : > { %2197 = vmatpush3.bf16.msra.mxu1 %v2406_v24  ;;  %2158 = vmatprep.subr.bf16.mxu0 %v2407_v25  ;;  %v2418_v24 = vld [vmem:[%s3054_s3 + $0x1b8] sm:$0xff]   ;;  %v387_v25 = vld [vmem:[%s2628_s24 + $0x48] sm:$0xff]  ;;  %v567_v15 = vmul.f32 %v2685_v2, %v446_v0 }
  0x25   : > { %2198 = vmatprep.subr.bf16.mxu1 %v2408_v27  ;;  %v392_v27 = vld [vmem:[%s2628_s24 + $0x6c] sm:$0xff]  ;;  %v436_v32 = vunpack.c.h.bf16 %v387_v25  ;;  %1455 = vmatprep.mubr.bf16.mxu0 %v804_v21  ;;  %v435_v46 = vunpack.c.l.bf16 %v387_v25  ;;  %v2427_v21 = vld [vmem:[%s3054_s3 + $0x160] sm:$0xff]  }
  0x26   : > { %v445_v37 = vunpack.c.h.bf16 %v392_v27  ;;  %v444_v48 = vunpack.c.l.bf16 %v392_v27  ;;  %v688_v25 = vadd.f32 %v2688_v3, %v567_v15  ;;  %v2428_v27 = vld [vmem:[%s3054_s3 + $0x1e0] sm:$0xff]   ;;  %v2434_v15 = vld [vmem:[%s3054_s3 + $0x198] sm:$0xff]  }
  0x27   : > { %2159 = vmatpush3.bf16.msra.mxu0 %v2409_v28  ;;  %v2713_v28 = vrot.slane %v2644_v39, %v511_v41  ;;  %v557_v45 = vmul.f32 %v2657_v50, %v436_v32  ;;  %v556_v60 = vmul.f32 %v2677_v62, %v435_v46  ;;  %v2430_v46 = vld [vmem:[%s3054_s3 + $0x1a0] sm:$0xff]  }
  0x28   : > { %2199 = vmatpush3.bf16.msra.mxu1 %v2410_v29  ;;  %2160 = vmatprep.subr.bf16.mxu0 %v2411_v30  ;;  %v806_v29 = vpack.c.bf16 %v743_v17, %v734_v16  ;;  %v733_v30 = vmax.f32 %v661_v18, 0.0  ;;  %v566_v52 = vmul.f32 %v2657_v50, %v445_v37  ;;  %v565_v61 = vmul.f32 %v2677_v62, %v444_v48  ;;  %v2425_v16 = vld [vmem:[%s3054_s3 + $0x128] sm:$0xff]   ;;  %v403_v37 = vld [vmem:[%s2628_s24 + $0xbc] sm:$0xff] }
  0x29   : > { %2200 = vmatprep.subr.bf16.mxu1 %v2412_v31  ;;  %v742_v31 = vmax.f32 %v670_v19, 0.0  ;;  %v677_v8 = vadd.f32 %v2680_v63, %v556_v60  ;;  %v2426_v17 = vld [vmem:[%s3054_s3 + $0x1a8] sm:$0xff]   ;;  %v2431_v60 = vld [vmem:[%s3054_s3 + $0x158] sm:$0xff]  }
  0x2a   : > { %1520 = vmatprep.mubr.bf16.mxu1 %v806_v29  ;;  %v687_v1 = vadd.f32 %v2660_v51, %v566_v52  ;;  %v686_v9 = vadd.f32 %v2680_v63, %v565_v61  ;;  %v397_v29 = vld [vmem:[%s2628_s24 + $0x90] sm:$0xff] }
  0x2b   : > { %2161 = vmatpush3.bf16.msra.mxu0 %v2413_v33  ;;  %v388_v33 = vld [vmem:[%s2628_s24 + $0x50] sm:$0xff]  ;;  %v805_v43 = vpack.c.bf16 %v742_v31, %v733_v30  ;;  %v749_v18 = vmax.f32 %v677_v8, 0.0  ;;  %v519_v31 = vsub.s32 6, %v2607_v26  ;;  %v454_v34 = vunpack.c.h.bf16 %v397_v29 }
  0x2c   : > { %2201 = vmatpush3.bf16.msra.mxu1 %v2414_v35  ;;  %2226 = vmatprep.subr.bf16.mxu0 %v2415_v54  ;;  %v803_v35 = vpack.c.bf16 %v740_v23, %v731_v22  ;;  %v438_v38 = vunpack.c.h.bf16 %v388_v33  ;;  %v568_v54 = vmul.f32 %v2666_v57, %v447_v40  ;;  %v437_v55 = vunpack.c.l.bf16 %v388_v33  ;;  %v402_v30 = vld [vmem:[%s2628_s24 + $0xb4] sm:$0xff]  ;;  %v2429_v40 = vld [vmem:[%s3054_s3 + $0x120] sm:$0xff]  }
  0x2d   : > { %2266 = vmatprep.subr.bf16.mxu1 %v2416_v59  ;;  %v678_v59 = vadd.f32 %v2660_v51, %v557_v45  ;;  %v759_v12 = vmax.f32 %v687_v1, 0.0  ;;  %v758_v19 = vmax.f32 %v686_v9, 0.0  ;;  %v2762_v22 = vrot.slane %v2644_v39, %v515_v42 }
  0x2e   : > { %1456 = vmatmul.mubr.bf16.vlgmr.msra.gmra.mxu0 %v803_v35  ;;  %v559_v53 = vmul.f32 %v2666_v57, %v438_v38  ;;  %v689_v5 = vadd.f32 %v2669_v58, %v568_v54  ;;  %v558_v10 = vmul.f32 %v2685_v2, %v437_v55  ;;  %v463_v35 = vunpack.c.h.bf16 %v402_v30 }
  0x2f   : > { %1521 = vmatmul.mubr.bf16.vlgmr.msra.gmra.mxu1 %v805_v43  ;;  %2227 = vmatpush3.bf16.msra.mxu0 %v2417_v20  ;;  %v750_v7 = vmax.f32 %v678_v59, 0.0  ;;  %v812_v32 = vpack.c.bf16 %v758_v19, %v749_v18  ;;  %v760_v38 = vmax.f32 %v688_v25, 0.0  ;;  %v453_v45 = vunpack.c.l.bf16 %v397_v29  ;;  %v2436_v25 = vld [vmem:[%s3054_s3 + $0x1d0] sm:$0xff]  }
  0x30   : > { %2267 = vmatpush3.bf16.msra.mxu1 %v2418_v24  ;;  %2228 = vmatprep.subr.bf16.mxu0 %v2419_v36  ;;  %v680_v4 = vadd.f32 %v2669_v58, %v559_v53  ;;  %v761_v14 = vmax.f32 %v689_v5, 0.0  ;;  %v679_v20 = vadd.f32 %v2688_v3, %v558_v10  ;;  %v398_v36 = vld [vmem:[%s2628_s24 + $0x98] sm:$0xff]  ;;  %v575_v48 = vmul.f32 %v2657_v50, %v454_v34 }
  0x31   : > { %2268 = vmatprep.subr.bf16.mxu1 %v2420_v44  ;;  %v813_v23 = vpack.c.bf16 %v759_v12, %v750_v7  ;;  %v456_v43 = vunpack.c.h.bf16 %v398_v36  ;;  %v465_v44 = vunpack.c.h.bf16 %v403_v37  ;;  %v462_v52 = vunpack.c.l.bf16 %v402_v30  ;;  %v2433_v10 = vld [vmem:[%s3054_s3 + $0x118] sm:$0xff]  }
  0x32   : > { %v752_v13 = vmax.f32 %v680_v4, 0.0  ;;  %v751_v33 = vmax.f32 %v679_v20, 0.0  ;;  %v455_v53 = vunpack.c.l.bf16 %v398_v36  ;;  %v464_v59 = vunpack.c.l.bf16 %v403_v37  ;;  %v2432_v4 = vld [vmem:[%s3054_s3 + $0x1d8] sm:$0xff]   ;;  %v408_v36 = vld [vmem:[%s2628_s24 + $0xe0] sm:$0xff] }
  0x33   : > { %2229 = vmatpush3.bf16.msra.mxu0 %v2421_v49  ;;  %1463 = vmatprep.mubr.bf16.mxu0 %v813_v23  ;;  %v584_v49 = vmul.f32 %v2657_v50, %v463_v35  ;;  %v577_v55 = vmul.f32 %v2666_v57, %v456_v43  ;;  %v696_v61 = vadd.f32 %v2660_v51, %v575_v48  ;;  %v523_v5 = vsub.s32 7, %v2607_v26  ;;  %v407_v34 = vld [vmem:[%s2628_s24 + $0xd8] sm:$0xff]  ;;  %v413_v43 = vld [vmem:[%s2628_s24 + $0x104] sm:$0xff] }
  0x34   : > { %2269 = vmatpush3.bf16.msra.mxu1 %v2422_v56  ;;  %v815_v24 = vpack.c.bf16 %v761_v14, %v752_v13  ;;  %2230 = vmatprep.subr.bf16.mxu0 %v2423_v6  ;;  %v814_v54 = vpack.c.bf16 %v760_v38, %v751_v33  ;;  %v586_v56 = vmul.f32 %v2666_v57, %v465_v44  ;;  %v2437_v33 = vld [vmem:[%s3054_s3 + $0x110] sm:$0xff]   ;;  %v412_v35 = vld [vmem:[%s2628_s24 + $0xfc] sm:$0xff]  ;;  %v474_v44 = vunpack.c.h.bf16 %v408_v36 }
  0x35   : > { %2270 = vmatprep.subr.bf16.mxu1 %v2424_v11  ;;  %v705_v0 = vadd.f32 %v2660_v51, %v584_v49  ;;  %v574_v1 = vmul.f32 %v2677_v62, %v453_v45  ;;  %v698_v6 = vadd.f32 %v2669_v58, %v577_v55  ;;  %v583_v8 = vmul.f32 %v2677_v62, %v462_v52 }
  0x36   : > { %1528 = vmatprep.mubr.bf16.mxu1 %v815_v24  ;;  %1464 = vmatmul.mubr.bf16.gmra.mxu0 %v812_v32  ;;  %v707_v7 = vadd.f32 %v2669_v58, %v586_v56  ;;  %v576_v9 = vmul.f32 %v2685_v2, %v455_v53  ;;  %v768_v11 = vmax.f32 %v696_v61, 0.0  ;;  %v585_v14 = vmul.f32 %v2685_v2, %v464_v59  ;;  %v2439_v59 = vld [vmem:[%s3054_s3 + $0x148] sm:$0xff]  }
  0x37   : > { %2231 = vmatpush3.bf16.msra.mxu0 %v2425_v16  ;;  %1529 = vmatmul.mubr.bf16.gmra.mxu1 %v814_v54  ;;  %v777_v12 = vmax.f32 %v705_v0, 0.0  ;;  %v695_v13 = vadd.f32 %v2680_v63, %v574_v1  ;;  %v2435_v16 = vld [vmem:[%s3054_s3 + $0x150] sm:$0xff]   ;;  %v704_v19 = vadd.f32 %v2680_v63, %v583_v8  ;;  %v2828_v37 = vrot.slane %v2644_v39, %v519_v31 }
  0x38   : > { %2271 = vmatpush3.bf16.msra.mxu1 %v2426_v17  ;;  %2232 = vmatprep.subr.bf16.mxu0 %v2427_v21  ;;  %v770_v17 = vmax.f32 %v698_v6, 0.0  ;;  %v779_v18 = vmax.f32 %v707_v7, 0.0  ;;  %v697_v20 = vadd.f32 %v2688_v3, %v576_v9  ;;  %v706_v24 = vadd.f32 %v2688_v3, %v585_v14 }
  0x39   : > { %2272 = vmatprep.subr.bf16.mxu1 %v2428_v27  ;;  %v822_v21 = vpack.c.bf16 %v777_v12, %v768_v11  ;;  %v767_v23 = vmax.f32 %v695_v13, 0.0  ;;  %v2817_v27 = vrot.slane %v2652_v47, %v515_v42  ;;  %v776_v30 = vmax.f32 %v704_v19, 0.0 }
  0x3a   : > { %v824_v29 = vpack.c.bf16 %v779_v18, %v770_v17  ;;  %v769_v32 = vmax.f32 %v697_v20, 0.0  ;;  %v778_v38 = vmax.f32 %v706_v24, 0.0  ;;  %v481_v42 = vunpack.c.h.bf16 %v412_v35  ;;  %v2446_v24 = vld [vmem:[%s3054_s3 + $0x180] sm:$0xff]  }
  0x3b   : > { %2233 = vmatpush3.bf16.msra.mxu0 %v2429_v40  ;;  %1471 = vmatprep.mubr.bf16.mxu0 %v822_v21  ;;  %v472_v40 = vunpack.c.h.bf16 %v407_v34  ;;  %v821_v45 = vpack.c.bf16 %v776_v30, %v767_v23  ;;  %v483_v48 = vunpack.c.h.bf16 %v413_v43  ;;  %v471_v49 = vunpack.c.l.bf16 %v407_v34  ;;  %v379_v30 = vld [vmem:[%s2628_s24 + $0x10] sm:$0xff] }
  0x3c   : > { %2273 = vmatpush3.bf16.msra.mxu1 %v2430_v46  ;;  %2234 = vmatprep.subr.bf16.mxu0 %v2431_v60  ;;  %v2438_v46 = vld [vmem:[%s3054_s3 + $0x190] sm:$0xff]   ;;  %v480_v52 = vunpack.c.l.bf16 %v412_v35  ;;  %v823_v53 = vpack.c.bf16 %v778_v38, %v769_v32  ;;  %v602_v55 = vmul.f32 %v2657_v50, %v481_v42  ;;  %v473_v56 = vunpack.c.l.bf16 %v408_v36  ;;  %v385_v42 = vld [vmem:[%s2628_s24 + $0x3c] sm:$0xff] }
  0x3d   : > { %2274 = vmatprep.subr.bf16.mxu1 %v2432_v4  ;;  %1536 = vmatprep.mubr.bf16.mxu1 %v824_v29  ;;  %v593_v54 = vmul.f32 %v2657_v50, %v472_v40  ;;  %v595_v60 = vmul.f32 %v2666_v57, %v474_v44  ;;  %v604_v61 = vmul.f32 %v2666_v57, %v483_v48  ;;  %v482_v1 = vunpack.c.l.bf16 %v413_v43  ;;  %v2440_v4 = vld [vmem:[%s3054_s3 + $0x1c8] sm:$0xff]   ;;  %v384_v32 = vld [vmem:[%s2628_s24 + $0x34] sm:$0xff] }
  0x3e   : > { %1472 = vmatmul.mubr.bf16.gmra.mxu0 %v821_v45  ;;  %v592_v0 = vmul.f32 %v2677_v62, %v471_v49  ;;  %v723_v6 = vadd.f32 %v2660_v51, %v602_v55  ;;  %v601_v7 = vmul.f32 %v2677_v62, %v480_v52  ;;  %v594_v8 = vmul.f32 %v2685_v2, %v473_v56  ;;  %v2441_v57 = vld [vmem:[%s3054_s3 + $0x108] sm:$0xff]  }
  0x3f   : > { %2235 = vmatpush3.bf16.msra.mxu0 %v2433_v10  ;;  %1537 = vmatmul.mubr.bf16.gmra.mxu1 %v823_v53  ;;  %v714_v50 = vadd.f32 %v2660_v51, %v593_v54  ;;  %v716_v9 = vadd.f32 %v2669_v58, %v595_v60  ;;  %v725_v10 = vadd.f32 %v2669_v58, %v604_v61  ;;  %v2442_v51 = vld [vmem:[%s3054_s3 + $0x188] sm:$0xff]   ;;  %v2443_v58 = vld [vmem:[%s3054_s3 + $0x140] sm:$0xff]   ;;  %v422_v38 = vunpack.c.h.bf16 %v379_v30 }
  0x40   : > { %2275 = vmatpush3.bf16.msra.mxu1 %v2434_v15  ;;  %2236 = vmatprep.subr.bf16.mxu0 %v2435_v16  ;;  %v713_v11 = vadd.f32 %v2680_v63, %v592_v0  ;;  %v603_v12 = vmul.f32 %v2685_v2, %v482_v1  ;;  %v795_v13 = vmax.f32 %v723_v6, 0.0  ;;  %v722_v14 = vadd.f32 %v2680_v63, %v601_v7  ;;  %v2444_v2 = vld [vmem:[%s3054_s3 + $0x1c0] sm:$0xff]  }
  0x41   : > { %2276 = vmatprep.subr.bf16.mxu1 %v2436_v25  ;;  %v786_v62 = vmax.f32 %v714_v50, 0.0  ;;  %v715_v15 = vadd.f32 %v2688_v3, %v594_v8  ;;  %v788_v16 = vmax.f32 %v716_v9, 0.0  ;;  %v797_v17 = vmax.f32 %v725_v10, 0.0  ;;  %v2445_v63 = vld [vmem:[%s3054_s3 + $0x100] sm:$0xff]  }
  0x42   : > { %v785_v18 = vmax.f32 %v713_v11, 0.0  ;;  %v724_v19 = vadd.f32 %v2688_v3, %v603_v12  ;;  %v794_v21 = vmax.f32 %v722_v14, 0.0  ;;  %v2877_v25 = vrot.slane %v2644_v39, %v523_v5  ;;  %v394_v8 = vld [vmem:[%s2628_s24 + $0x7c] sm:$0xff] }
  0x43   : > { %2237 = vmatpush3.bf16.msra.mxu0 %v2437_v33  ;;  %v831_v20 = vpack.c.bf16 %v795_v13, %v786_v62  ;;  %v787_v23 = vmax.f32 %v715_v15, 0.0  ;;  %v833_v29 = vpack.c.bf16 %v797_v17, %v788_v16  ;;  %v380_v33 = vld [vmem:[%s2628_s24 + $0x18] sm:$0xff]  ;;  %v2885_v34 = vrot.slane %v2652_v47, %v523_v5  ;;  %v390_v12 = vld [vmem:[%s2628_s24 + $0x60] sm:$0xff] }
  0x44   : > { %2277 = vmatpush3.bf16.msra.mxu1 %v2438_v46  ;;  %2238 = vmatprep.subr.bf16.mxu0 %v2439_v59  ;;  %v796_v3 = vmax.f32 %v724_v19, 0.0  ;;  %v2890_v35 = vrot.slane %v2652_v47, %v511_v41  ;;  %v830_v36 = vpack.c.bf16 %v794_v21, %v785_v18  ;;  %v421_v39 = vunpack.c.l.bf16 %v379_v30  ;;  %v2896_v46 = vld [vmem:[%s3054_s3 + $0x238] sm:$0xff]  }
  0x45   : > { %2278 = vmatprep.subr.bf16.mxu1 %v2440_v4  ;;  %1479 = vmatprep.mubr.bf16.mxu0 %v831_v20  ;;  %v430_v40 = vunpack.c.l.bf16 %v384_v32  ;;  %v431_v44 = vunpack.c.h.bf16 %v384_v32  ;;  %v423_v45 = vunpack.c.l.bf16 %v380_v33  ;;  %v424_v5 = vunpack.c.h.bf16 %v380_v33  ;;  %v389_v59 = vld [vmem:[%s2628_s24 + $0x58] sm:$0xff]  ;;  %v2933_v32 = vld [vmem:[%s2628_s24 + $0xa0] sm:$0xff] }
  0x46   : > { %1544 = vmatprep.mubr.bf16.mxu1 %v833_v29  ;;  %v832_v43 = vpack.c.bf16 %v796_v3, %v787_v23  ;;  %1480 = vmatmul.mubr.bf16.gmra.mxu0 %v830_v36  ;;  %v542_v41 = vmul.f32 %v2713_v28, %v421_v39  ;;  %v543_v48 = vmul.f32 %v2762_v22, %v422_v38  ;;  %v432_v52 = vunpack.c.l.bf16 %v385_v42 }
  0x47   : > { %2239 = vmatpush3.bf16.msra.mxu0 %v2441_v57  ;;  %v551_v49 = vmul.f32 %v2713_v28, %v430_v40  ;;  %v552_v53 = vmul.f32 %v2762_v22, %v431_v44  ;;  %v433_v54 = vunpack.c.h.bf16 %v385_v42  ;;  %v544_v55 = vmul.f32 %v2828_v37, %v423_v45  ;;  %v404_v45 = vld [vmem:[%s2628_s24 + $0xc4] sm:$0xff] }
  0x48   : > { %2279 = vmatpush3.bf16.msra.mxu1 %v2442_v51  ;;  %2240 = vmatprep.subr.bf16.mxu0 %v2443_v58  ;;  %v545_v56 = vmul.f32 %v2877_v25, %v424_v5  ;;  %v664_v60 = vadd.f32 %v2817_v27, %v543_v48  ;;  %v553_v61 = vmul.f32 %v2828_v37, %v432_v52  ;;  %v440_v11 = vunpack.c.h.bf16 %v389_v59  ;;  %v395_v51 = vld [vmem:[%s2628_s24 + $0x84] sm:$0xff] }
  0x49   : > { %2280 = vmatprep.subr.bf16.mxu1 %v2444_v2  ;;  %1545 = vmatmul.mubr.bf16.gmra.mxu1 %v832_v43  ;;  %v663_v0 = vadd.f32 %v2890_v35, %v542_v41  ;;  %v672_v1 = vadd.f32 %v2890_v35, %v551_v49  ;;  %v673_v4 = vadd.f32 %v2817_v27, %v552_v53  ;;  %v442_v18 = vunpack.c.h.bf16 %v390_v12  ;;  %v2449_v49 = vld [vmem:[%s3054_s3 + $0x228] sm:$0xff]  }
  0x4a   : > { %v554_v50 = vmul.f32 %v2877_v25, %v433_v54  ;;  %v666_v6 = vadd.f32 %v2885_v34, %v545_v56  ;;  %v2915_v7 = vrot.slane %v2652_v47, %v519_v31  ;;  %v736_v57 = vmax.f32 %v664_v60, 0.0 }
  0x4b   : > { %2241 = vmatpush3.bf16.msra.mxu0 %v2445_v63  ;;  %v735_v9 = vmax.f32 %v663_v0, 0.0  ;;  %v744_v10 = vmax.f32 %v672_v1, 0.0  ;;  %v745_v62 = vmax.f32 %v673_v4, 0.0  ;;  %v449_v31 = vunpack.c.h.bf16 %v394_v8  ;;  %v2448_v63 = vld [vmem:[%s3054_s3 + $0x230] sm:$0xff]  }
  0x4c   : > { %2281 = vmatpush3.bf16.msra.mxu1 %v2446_v24  ;;  %2318 = vmatprep.subr.bf16.mxu0 %v2896_v46  ;;  %v675_v13 = vadd.f32 %v2885_v34, %v554_v50  ;;  %v738_v14 = vmax.f32 %v666_v6, 0.0  ;;  %v665_v26 = vadd.f32 %v2915_v7, %v544_v55  ;;  %v674_v47 = vadd.f32 %v2915_v7, %v553_v61  ;;  %v405_v4 = vld [vmem:[%s2628_s24 + $0xcc] sm:$0xff] }
  0x4d   : > { %2342 = vmatprep.subr.bf16.mxu1 %v2896_v46  ;;  %v807_v15 = vpack.c.bf16 %v744_v10, %v735_v9  ;;  %v561_v58 = vmul.f32 %v2762_v22, %v440_v11  ;;  %v808_v2 = vpack.c.bf16 %v745_v62, %v736_v57  ;;  %v570_v20 = vmul.f32 %v2762_v22, %v449_v31  ;;  %v2450_v62 = vld [vmem:[%s3054_s3 + $0x220] sm:$0xff]  }
  0x4e   : > { %v747_v16 = vmax.f32 %v675_v13, 0.0  ;;  %v737_v17 = vmax.f32 %v665_v26, 0.0  ;;  %v746_v19 = vmax.f32 %v674_v47, 0.0  ;;  %v451_v23 = vunpack.c.h.bf16 %v395_v51 }
  0x4f   : > { %v682_v21 = vadd.f32 %v2817_v27, %v561_v58  ;;  %1585 = vmatprep.mubr.bf16.mxu0 %v808_v2  ;;  %v563_v29 = vmul.f32 %v2877_v25, %v442_v18  ;;  %v439_v3 = vunpack.c.l.bf16 %v389_v59  ;;  %v448_v30 = vunpack.c.l.bf16 %v394_v8  ;;  %v400_v59 = vld [vmem:[%s2628_s24 + $0xa8] sm:$0xff] }
  0x50   : > { %v810_v24 = vpack.c.bf16 %v747_v16, %v738_v14  ;;  %1586 = vmatmul.mubr.bf16.vlgmr.msra.gmra.mxu0 %v807_v15  ;;  %v809_v33 = vpack.c.bf16 %v746_v19, %v737_v17  ;;  %v691_v36 = vadd.f32 %v2817_v27, %v570_v20  ;;  %v572_v38 = vmul.f32 %v2877_v25, %v451_v23  ;;  %v409_v18 = vld [vmem:[%s2628_s24 + $0xe8] sm:$0xff] }
  0x51   : > { %v754_v39 = vmax.f32 %v682_v21, 0.0  ;;  %2319 = vmatpush3.bf16.msra.mxu0 %v2896_v46  ;;  %v684_v40 = vadd.f32 %v2885_v34, %v563_v29  ;;  %v560_v42 = vmul.f32 %v2713_v28, %v439_v3  ;;  %v569_v43 = vmul.f32 %v2713_v28, %v448_v30  ;;  %v2451_v30 = vld [vmem:[%s3054_s3 + $0x218] sm:$0xff]  }
  0x52   : > { %1650 = vmatprep.mubr.bf16.mxu1 %v810_v24  ;;  %v441_v44 = vunpack.c.l.bf16 %v390_v12  ;;  %2320 = vmatprep.subr.bf16.mxu0 %v2448_v63  ;;  %v763_v5 = vmax.f32 %v691_v36, 0.0  ;;  %v693_v41 = vadd.f32 %v2885_v34, %v572_v38  ;;  %v450_v48 = vunpack.c.l.bf16 %v395_v51 }
  0x53   : > { %1651 = vmatmul.mubr.bf16.vlgmr.msra.gmra.mxu1 %v809_v33  ;;  %v458_v52 = vunpack.c.h.bf16 %v2933_v32  ;;  %v756_v53 = vmax.f32 %v684_v40, 0.0  ;;  %v681_v54 = vadd.f32 %v2890_v35, %v560_v42  ;;  %v690_v55 = vadd.f32 %v2890_v35, %v569_v43  ;;  %v410_v33 = vld [vmem:[%s2628_s24 + $0xf0] sm:$0xff] }
  0x54   : > { %2350 = vmatpush3.bf16.msra.mxu1 %v2896_v46  ;;  %v562_v56 = vmul.f32 %v2828_v37, %v441_v44  ;;  %v817_v60 = vpack.c.bf16 %v763_v5, %v754_v39  ;;  %v765_v61 = vmax.f32 %v693_v41, 0.0  ;;  %v571_v0 = vmul.f32 %v2828_v37, %v450_v48  ;;  %v415_v5 = vld [vmem:[%s2628_s24 + $0x114] sm:$0xff] }
  0x55   : > { %2343 = vmatprep.subr.bf16.mxu1 %v2448_v63  ;;  %v467_v1 = vunpack.c.h.bf16 %v404_v45  ;;  %2321 = vmatpush3.bf16.msra.mxu0 %v2448_v63  ;;  %v753_v50 = vmax.f32 %v681_v54, 0.0  ;;  %v762_v6 = vmax.f32 %v690_v55, 0.0  ;;  %v579_v8 = vmul.f32 %v2762_v22, %v458_v52 }
  0x56   : > { %v683_v46 = vadd.f32 %v2915_v7, %v562_v56  ;;  %1593 = vmatprep.mubr.bf16.mxu0 %v817_v60  ;;  %v819_v57 = vpack.c.bf16 %v765_v61, %v756_v53  ;;  %v692_v9 = vadd.f32 %v2915_v7, %v571_v0  ;;  %2322 = vmatprep.subr.bf16.mxu0 %v2449_v49  ;;  %v460_v11 = vunpack.c.h.bf16 %v400_v59 }
  0x57   : > { %v588_v10 = vmul.f32 %v2762_v22, %v467_v1  ;;  %v816_v12 = vpack.c.bf16 %v762_v6, %v753_v50  ;;  %v700_v13 = vadd.f32 %v2817_v27, %v579_v8  ;;  %v469_v14 = vunpack.c.h.bf16 %v405_v4 }
  0x58   : > { %2351 = vmatpush3.bf16.msra.mxu1 %v2448_v63  ;;  %v755_v51 = vmax.f32 %v683_v46, 0.0  ;;  %1658 = vmatprep.mubr.bf16.mxu1 %v819_v57  ;;  %v764_v26 = vmax.f32 %v692_v9, 0.0  ;;  %v581_v47 = vmul.f32 %v2877_v25, %v460_v11  ;;  %v457_v31 = vunpack.c.l.bf16 %v2933_v32  ;;  %v414_v32 = vld [vmem:[%s2628_s24 + $0x10c] sm:$0xff]  ;;  %v381_v11 = vld [vmem:[%s2628_s24 + $0x20] ss:$36 sps:$4 sm:$0xff]  }
  0x59   : > { %2344 = vmatprep.subr.bf16.mxu1 %v2449_v49  ;;  %v709_v15 = vadd.f32 %v2817_v27, %v588_v10  ;;  %1594 = vmatmul.mubr.bf16.gmra.mxu0 %v816_v12  ;;  %v772_v58 = vmax.f32 %v700_v13, 0.0  ;;  %v590_v2 = vmul.f32 %v2877_v25, %v469_v14  ;;  %v466_v16 = vunpack.c.l.bf16 %v404_v45  ;;  %v2453_v13 = vld [vmem:[%s3054_s3 + $0x208] sm:$0xff]  }
  0x5a   : > { %v459_v17 = vunpack.c.l.bf16 %v400_v59  ;;  %v818_v19 = vpack.c.bf16 %v764_v26, %v755_v51  ;;  %2323 = vmatpush3.bf16.msra.mxu0 %v2449_v49  ;;  %v702_v20 = vadd.f32 %v2885_v34, %v581_v47  ;;  %v578_v21 = vmul.f32 %v2713_v28, %v457_v31  ;;  %v2452_v59 = vld [vmem:[%s3054_s3 + $0x210] sm:$0xff]  }
  0x5b   : > { %v781_v63 = vmax.f32 %v709_v15, 0.0  ;;  %2324 = vmatprep.subr.bf16.mxu0 %v2450_v62  ;;  %v711_v23 = vadd.f32 %v2885_v34, %v590_v2  ;;  %v587_v24 = vmul.f32 %v2713_v28, %v466_v16  ;;  %v468_v29 = vunpack.c.l.bf16 %v405_v4  ;;  %v2031_v15 = vld [vmem:[%s3052_s1 + $0x8] ss:$0 sm:$0xff]  ;;  %v401_v2 = vld [vmem:[%s2628_s24 + $0xb0] ss:$36 sps:$4 sm:$0xff]  }
  0x5c   : > { %2352 = vmatpush3.bf16.msra.mxu1 %v2449_v49  ;;  %v580_v3 = vmul.f32 %v2828_v37, %v459_v17  ;;  %v774_v39 = vmax.f32 %v702_v20, 0.0  ;;  %v699_v38 = vadd.f32 %v2890_v35, %v578_v21  ;;  %v476_v40 = vunpack.c.h.bf16 %v409_v18 }
  0x5d   : > { %1659 = vmatmul.mubr.bf16.gmra.mxu1 %v818_v19  ;;  %2345 = vmatprep.subr.bf16.mxu1 %v2450_v62  ;;  %v826_v36 = vpack.c.bf16 %v781_v63, %v772_v58  ;;  %v783_v42 = vmax.f32 %v711_v23, 0.0  ;;  %v708_v43 = vadd.f32 %v2890_v35, %v587_v24  ;;  %v589_v44 = vmul.f32 %v2828_v37, %v468_v29  ;;  %v2032_v19 = vld [vmem:[%s3053_s2 + $0x8] ss:$0 sm:$0xff] }
  0x5e   : > { %v701_v45 = vadd.f32 %v2915_v7, %v580_v3  ;;  %2325 = vmatpush3.bf16.msra.mxu0 %v2450_v62  ;;  %v771_v41 = vmax.f32 %v699_v38, 0.0  ;;  %v485_v48 = vunpack.c.h.bf16 %v414_v32  ;;  %v597_v49 = vmul.f32 %v2762_v22, %v476_v40  ;;  %v391_v23 = vld [vmem:[%s2628_s24 + $0x68] ss:$36 sps:$4 sm:$0xff]  }
  0x5f   : > { %1601 = vmatprep.mubr.bf16.mxu0 %v826_v36  ;;  %v478_v52 = vunpack.c.h.bf16 %v410_v33  ;;  %v828_v53 = vpack.c.bf16 %v783_v42, %v774_v39  ;;  %v780_v54 = vmax.f32 %v708_v43, 0.0  ;;  %v710_v55 = vadd.f32 %v2915_v7, %v589_v44  ;;  %2326 = vmatprep.subr.bf16.mxu0 %v2451_v30 }
  0x60   : > { %2353 = vmatpush3.bf16.msra.mxu1 %v2450_v62  ;;  %v773_v56 = vmax.f32 %v701_v45, 0.0  ;;  %v606_v60 = vmul.f32 %v2762_v22, %v485_v48  ;;  %v718_v61 = vadd.f32 %v2817_v27, %v597_v49  ;;  %v487_v0 = vunpack.c.h.bf16 %v415_v5 }
  0x61   : > { %2346 = vmatprep.subr.bf16.mxu1 %v2451_v30  ;;  %v599_v1 = vmul.f32 %v2877_v25, %v478_v52  ;;  %1666 = vmatprep.mubr.bf16.mxu1 %v828_v53  ;;  %v825_v4 = vpack.c.bf16 %v780_v54, %v771_v41  ;;  %v782_v50 = vmax.f32 %v710_v55, 0.0  ;;  %v475_v6 = vunpack.c.l.bf16 %v409_v18 }
  0x62   : > { %v484_v46 = vunpack.c.l.bf16 %v414_v32  ;;  %2327 = vmatpush3.bf16.msra.mxu0 %v2451_v30  ;;  %v727_v8 = vadd.f32 %v2817_v27, %v606_v60  ;;  %v790_v57 = vmax.f32 %v718_v61, 0.0  ;;  %v608_v9 = vmul.f32 %v2877_v25, %v487_v0  ;;  %v411_v32 = vld [vmem:[%s2628_s24 + $0xf8] ss:$36 sps:$4 sm:$0xff]   ;;  %s2029_s24 = sshll.u32 %s3072_s6, 2  ;;  %s2030_s6 = sshll.u32 %s3074_s18, 3 }
  0x63   : > { %v720_v10 = vadd.f32 %v2885_v34, %v599_v1  ;;  %1602 = vmatmul.mubr.bf16.gmra.mxu0 %v825_v4  ;;  %v827_v22 = vpack.c.bf16 %v782_v50, %v773_v56  ;;  %v596_v12 = vmul.f32 %v2713_v28, %v475_v6  ;;  %v477_v62 = vunpack.c.l.bf16 %v410_v33  ;;  %2328 = vmatprep.subr.bf16.mxu0 %v2452_v59  ;;  %s355_s23 = scalar_lea.vmem %s3055_s4, %s2029_s24  ;;  %s363_s27 = scalar_lea.vmem %s3056_s5, %s2030_s6 }
  0x64   : > { %2354 = vmatpush3.bf16.msra.mxu1 %v2451_v30  ;;  %v605_v51 = vmul.f32 %v2713_v28, %v484_v46  ;;  %v799_v27 = vmax.f32 %v727_v8, 0.0  ;;  %v729_v25 = vadd.f32 %v2885_v34, %v608_v9  ;;  %v486_v26 = vunpack.c.l.bf16 %v415_v5 }
  0x65   : > { %2347 = vmatprep.subr.bf16.mxu1 %v2452_v59  ;;  %v792_v14 = vmax.f32 %v720_v10, 0.0  ;;  %1667 = vmatmul.mubr.bf16.gmra.mxu1 %v827_v22  ;;  %v717_v47 = vadd.f32 %v2890_v35, %v596_v12  ;;  %v598_v31 = vmul.f32 %v2828_v37, %v477_v62  ;;  %v425_v58 = vunpack.c.l.bf16 %v381_v11 }
  0x66   : > { %v726_v28 = vadd.f32 %v2890_v35, %v605_v51  ;;  %2329 = vmatpush3.bf16.msra.mxu0 %v2452_v59  ;;  %v835_v16 = vpack.c.bf16 %v799_v27, %v790_v57  ;;  %v801_v17 = vmax.f32 %v729_v25, 0.0  ;;  %v607_v34 = vmul.f32 %v2828_v37, %v486_v26  ;;  %v2454_v37 = vld [vmem:[%s3054_s3 + $0x200] sm:$0xff]  }
  0x67   : > { %v434_v18 = vunpack.c.h.bf16 %v381_v11  ;;  %v789_v63 = vmax.f32 %v717_v47, 0.0  ;;  %v719_v35 = vadd.f32 %v2915_v7, %v598_v31  ;;  %2330 = vmatprep.subr.bf16.mxu0 %v2453_v13  ;;  %v546_v21 = vmul.f32 %v2031_v15, %v425_v58 }
  0x68   : > { %2355 = vmatpush3.bf16.msra.mxu1 %v2452_v59  ;;  %v798_v20 = vmax.f32 %v726_v28, 0.0  ;;  %1609 = vmatprep.mubr.bf16.mxu0 %v835_v16  ;;  %v837_v24 = vpack.c.bf16 %v801_v17, %v792_v14  ;;  %v728_v29 = vadd.f32 %v2915_v7, %v607_v34  ;;  %v461_v30 = vunpack.c.l.bf16 %v401_v2 }
  0x69   : > { %2348 = vmatprep.subr.bf16.mxu1 %v2453_v13  ;;  %v555_v3 = vmul.f32 %v2031_v15, %v434_v18  ;;  %v791_v36 = vmax.f32 %v719_v35, 0.0  ;;  %v667_v39 = vadd.f32 %v2032_v19, %v546_v21  ;;  %v470_v38 = vunpack.c.h.bf16 %v401_v2 }
  0x6a   : > { %v834_v33 = vpack.c.bf16 %v798_v20, %v789_v63  ;;  %1674 = vmatprep.mubr.bf16.mxu1 %v837_v24  ;;  %v800_v40 = vmax.f32 %v728_v29, 0.0  ;;  %2331 = vmatpush3.bf16.msra.mxu0 %v2453_v13  ;;  %v582_v43 = vmul.f32 %v2031_v15, %v461_v30  ;;  %v443_v44 = vunpack.c.l.bf16 %v391_v23 }
  0x6b   : > { %v676_v42 = vadd.f32 %v2032_v19, %v555_v3  ;;  %v739_v7 = vmax.f32 %v667_v39, 0.0  ;;  %v591_v45 = vmul.f32 %v2031_v15, %v470_v38  ;;  %v452_v5 = vunpack.c.h.bf16 %v391_v23  ;;  %2332 = vmatprep.subr.bf16.mxu0 %v2454_v37 }
  0x6c   : > { %1610 = vmatmul.mubr.bf16.gmra.mxu0 %v834_v33  ;;  %2356 = vmatpush3.bf16.msra.mxu1 %v2453_v13  ;;  %v479_v41 = vunpack.c.l.bf16 %v411_v32  ;;  %v836_v48 = vpack.c.bf16 %v800_v40, %v791_v36  ;;  %v703_v52 = vadd.f32 %v2032_v19, %v582_v43  ;;  %v564_v53 = vmul.f32 %v2031_v15, %v443_v44 }
  0x6d   : > { %2349 = vmatprep.subr.bf16.mxu1 %v2454_v37  ;;  %v748_v49 = vmax.f32 %v676_v42, 0.0  ;;  %v712_v54 = vadd.f32 %v2032_v19, %v591_v45  ;;  %v573_v55 = vmul.f32 %v2031_v15, %v452_v5  ;;  %v488_v56 = vunpack.c.h.bf16 %v411_v32 }
  0x6e   : > { %v600_v59 = vmul.f32 %v2031_v15, %v479_v41  ;;  %1675 = vmatmul.mubr.bf16.gmra.mxu1 %v836_v48  ;;  %2333 = vmatpush3.bf16.msra.mxu0 %v2454_v37  ;;  %v775_v61 = vmax.f32 %v703_v52, 0.0  ;;  %v685_v0 = vadd.f32 %v2032_v19, %v564_v53 }
  0x6f   : > { %v811_v60 = vpack.c.bf16 %v748_v49, %v739_v7  ;;  %v784_v1 = vmax.f32 %v712_v54, 0.0  ;;  %v694_v4 = vadd.f32 %v2032_v19, %v573_v55  ;;  %v609_v50 = vmul.f32 %v2031_v15, %v488_v56 }
  0x70   : > { %2357 = vmatpush3.bf16.msra.mxu1 %v2454_v37  ;;  %v721_v6 = vadd.f32 %v2032_v19, %v600_v59  ;;  %v757_v46 = vmax.f32 %v685_v0, 0.0 }
  0x71   : > { %2334 = vmatprep.mubr.bf16.mxu0 %v811_v60  ;;  %v829_v8 = vpack.c.bf16 %v784_v1, %v775_v61  ;;  %v766_v57 = vmax.f32 %v694_v4, 0.0  ;;  %v730_v9 = vadd.f32 %v2032_v19, %v609_v50 }
  0x72   : > { %v793_v10 = vmax.f32 %v721_v6, 0.0 }
  0x73   : > { %2338 = vmatprep.mubr.bf16.mxu1 %v829_v8  ;;  %v820_v11 = vpack.c.bf16 %v766_v57, %v757_v46  ;;  %v802_v22 = vmax.f32 %v730_v9, 0.0 }
  0x75   : > { %2335 = vmatmul.mubr.bf16.vlgmr.msra.gmra.mxu0 %v820_v11  ;;  %v838_v12 = vpack.c.bf16 %v802_v22, %v793_v10 }
  0x77   : > { %2339 = vmatmul.mubr.bf16.vlgmr.msra.gmra.mxu1 %v838_v12 }
  0xee   : > { %v2162_v51 = vpop.f32.mrf.mxu0 }
  0xef   : > { %v2202_v62 = vpop.f32.mrf.mxu1 }
  0xf0   : > { %v2163_v13 = vpop.f32.mrf.mxu0 }
  0xf1   : > { %v2203_v27 = vpop.f32.mrf.mxu1  ;;  %v2164_v6 = vadd.f32 %v2163_v13, %v2162_v51 }
  0xf2   : > { %v2165_v25 = vpop.f32.mrf.mxu0  ;;  %v2204_v46 = vadd.f32 %v2203_v27, %v2202_v62 }
  0xf3   : > { %v2205_v14 = vpop.f32.mrf.mxu1 }
  0xf4   : > { %v2166_v26 = vpop.f32.mrf.mxu0  ;;  %v1523_v62 = vadd.f32 %v2204_v46, %v2164_v6 }
  0xf5   : > { %v2206_v15 = vpop.f32.mrf.mxu1  ;;  %v2167_v8 = vadd.f32 %v2166_v26, %v2165_v25 }
  0xf6   : > { %v2168_v47 = vpop.f32.mrf.mxu0  ;;  %v2207_v57 = vadd.f32 %v2206_v15, %v2205_v14 }
  0xf7   : > { %v2208_v31 = vpop.f32.mrf.mxu1 }
  0xf8   : > { %v2169_v28 = vpop.f32.mrf.mxu0  ;;  %v1526_v25 = vadd.f32 %v2207_v57, %v2167_v8 }
  0xf9   : > { %v2209_v2 = vpop.f32.mrf.mxu1  ;;  %v2170_v9 = vadd.f32 %v2169_v28, %v2168_v47 }
  0xfa   : > { %v2171_v58 = vpop.f32.mrf.mxu0  ;;  %v2210_v10 = vadd.f32 %v2209_v2, %v2208_v31 }
  0xfb   : > { %v2211_v16 = vpop.f32.mrf.mxu1 }
  0xfc   : > { %v2172_v17 = vpop.f32.mrf.mxu0  ;;  %v1531_v26 = vadd.f32 %v2210_v10, %v2170_v9 }
  0xfd   : > { %v2212_v34 = vpop.f32.mrf.mxu1  ;;  %v2173_v12 = vadd.f32 %v2172_v17, %v2171_v58 }
  0xfe   : > { %v2174_v18 = vpop.f32.mrf.mxu0 }
  0xff   : > { %v2214_v19 = vpop.f32.mrf.mxu1 }
 0x100   : > { %v2175_v63 = vpop.f32.mrf.mxu0 }
 0x101   : > { %v2215_v20 = vpop.f32.mrf.mxu1  ;;  %v2176_v47 = vadd.f32 %v2175_v63, %v2174_v18 }
 0x102   : > { %v2177_v35 = vpop.f32.mrf.mxu0  ;;  %v2216_v2 = vadd.f32 %v2215_v20, %v2214_v19 }
 0x103   : > { %v2217_v21 = vpop.f32.mrf.mxu1 }
 0x104   : > { %v2178_v23 = vpop.f32.mrf.mxu0  ;;  %v1539_v20 = vadd.f32 %v2216_v2, %v2176_v47 }
 0x105   : > { %v2218_v24 = vpop.f32.mrf.mxu1  ;;  %v2179_v58 = vadd.f32 %v2178_v23, %v2177_v35 }
 0x106   : > { %v2180_v29 = vpop.f32.mrf.mxu0 }
 0x108   : > { %v2181_v3 = vpop.f32.mrf.mxu0 }
 0x109   : > { %v2220_v37 = vpop.f32.mrf.mxu1 }
 0x10a   : > { %v2183_v32 = vpop.f32.mrf.mxu0 }
 0x10b   : > { %v2221_v30 = vpop.f32.mrf.mxu1 }
 0x10c   : > { %v2184_v36 = vpop.f32.mrf.mxu0 }
 0x10d   : > { %v2223_v33 = vpop.f32.mrf.mxu1 }
 0x10f   : > { %v2224_v39 = vpop.f32.mrf.mxu1 }
 0x110   : > { %v2242_v38 = vpop.f32.mrf.mxu0  ;;  %v2225_v13 = vadd.f32 %v2224_v39, %v2223_v33 }
 0x112   : > { %v2243_v42 = vpop.f32.mrf.mxu0 }
 0x113   : > { %v3018_v40 = vpop.f32.mrf.mxu1 }
 0x114   : > { %3057 = vst [vmem:[#allocation3_spill] sm:$0xff] %v3018_v40  ;;  %v2245_v44 = vpop.f32.mrf.mxu0 }
 0x115   : > { %v3020_v43 = vpop.f32.mrf.mxu1 }
 0x116   : > { %3058 = vst [vmem:[#allocation4_spill] sm:$0xff] %v3020_v43  ;;  %v2246_v45 = vpop.f32.mrf.mxu0  ;;  %v2222_v43 = vadd.f32 %v2221_v30, %v2220_v37 }
 0x117   : > { %v3022_v7 = vpop.f32.mrf.mxu1  ;;  %v2247_v30 = vadd.f32 %v2246_v45, %v2245_v44 }
 0x118   : > { %3059 = vst [vmem:[#allocation5_spill] sm:$0xff] %v3022_v7  ;;  %v2182_v7 = vadd.f32 %v2181_v3, %v2180_v29  ;;  %v2244_v29 = vadd.f32 %v2243_v42, %v2242_v38 }
 0x119   : > { %v3024_v5 = vpop.f32.mrf.mxu1  ;;  %v2248_v41 = vpop.f32.mrf.mxu0 }
 0x11a   : > { %3060 = vst [vmem:[#allocation6_spill] sm:$0xff] %v3024_v5  ;;  %v2213_v5 = vadd.f32 %v2212_v34, %v2211_v16  ;;  %v2219_v16 = vadd.f32 %v2218_v24, %v2217_v21  ;;  %v1547_v34 = vadd.f32 %v2222_v43, %v2182_v7  ;;  %v1588_v35 = vadd.f32 %v2244_v29, %v1523_v62 }
 0x11b   : > { %v2249_v48 = vpop.f32.mrf.mxu0  ;;  %v3062_v21 = vld [vmem:[#allocation3_spill] sm:$0xff]  ;;  %v1591_v43 = vadd.f32 %v2247_v30, %v1526_v25 }
 0x11c   : > { %v2250_v51 = vadd.f32 %v2249_v48, %v2248_v41  ;;  %v1534_v28 = vadd.f32 %v2213_v5, %v2173_v12  ;;  %v1542_v42 = vadd.f32 %v2219_v16, %v2179_v58 }
 0x11d   : > { %v2288_v49 = vpop.f32.mrf.mxu1  ;;  %v2251_v52 = vpop.f32.mrf.mxu0  ;;  %v3063_v23 = vld [vmem:[#allocation4_spill] sm:$0xff] }
 0x11e   : > { %v2284_v24 = vadd.f32 %v3063_v23, %v3062_v21 }
 0x11f   : > { %v2289_v53 = vpop.f32.mrf.mxu1  ;;  %v2252_v54 = vpop.f32.mrf.mxu0  ;;  %v3064_v44 = vld [vmem:[#allocation5_spill] sm:$0xff] }
 0x120   : > { %v2253_v14 = vadd.f32 %v2252_v54, %v2251_v52  ;;  %v2290_v39 = vadd.f32 %v2289_v53, %v2288_v49  ;;  %v1653_v8 = vadd.f32 %v2284_v24, %v1588_v35 }
 0x121   : > { %v2291_v55 = vpop.f32.mrf.mxu1  ;;  %v3065_v7 = vld [vmem:[#allocation6_spill] sm:$0xff] }
 0x122   : > { %v1599_v41 = vadd.f32 %v2253_v14, %v1534_v28  ;;  %v2287_v45 = vadd.f32 %v3065_v7, %v3064_v44 }
 0x123   : > { %v2292_v56 = vpop.f32.mrf.mxu1  ;;  %v2254_v59 = vpop.f32.mrf.mxu0 }
 0x124   : > { %v2293_v48 = vadd.f32 %v2292_v56, %v2291_v55 }
 0x125   : > { %v2294_v60 = vpop.f32.mrf.mxu1  ;;  %v2255_v61 = vpop.f32.mrf.mxu0 }
 0x126   : > { %v2256_v52 = vadd.f32 %v2255_v61, %v2254_v59  ;;  %v1664_v61 = vadd.f32 %v2293_v48, %v1599_v41 }
 0x127   : > { %v2295_v0 = vpop.f32.mrf.mxu1  ;;  %v2257_v1 = vpop.f32.mrf.mxu0 }
 0x128   : > { %v1604_v49 = vadd.f32 %v2256_v52, %v1539_v20  ;;  %v2296_v53 = vadd.f32 %v2295_v0, %v2294_v60  ;;  %v1656_v0 = vadd.f32 %v2287_v45, %v1591_v43 }
 0x129   : > { %v3026_v4 = vpop.f32.mrf.mxu1  ;;  %v2258_v50 = vpop.f32.mrf.mxu0 }
 0x12a   : > { %3061 = vst [vmem:[#allocation7_spill] sm:$0xff] %v3026_v4  ;;  %v2185_v4 = vadd.f32 %v2184_v36, %v2183_v32  ;;  %v1596_v32 = vadd.f32 %v2250_v51, %v1531_v26  ;;  %v2259_v54 = vadd.f32 %v2258_v50, %v2257_v1 }
 0x12b   : > { %v2298_v11 = vpop.f32.mrf.mxu1 }
 0x12c   : > { %v2260_v22 = vpop.f32.mrf.mxu0  ;;  %v1550_v3 = vadd.f32 %v2225_v13, %v2185_v4  ;;  %v1661_v55 = vadd.f32 %v2290_v39, %v1596_v32  ;;  %v1607_v1 = vadd.f32 %v2259_v54, %v1542_v42  ;;  %v1669_v13 = vadd.f32 %v2296_v53, %v1604_v49 }
 0x12e   : > { %v2261_v40 = vpop.f32.mrf.mxu0  ;;  %v2300_v27 = vpop.f32.mrf.mxu1 }
 0x12f   : > { %v2262_v31 = vadd.f32 %v2261_v40, %v2260_v22 }
 0x130   : > { %v2263_v15 = vpop.f32.mrf.mxu0  ;;  %v2301_v17 = vpop.f32.mrf.mxu1 }
 0x131   : > { %v1612_v5 = vadd.f32 %v2262_v31, %v1547_v34  ;;  %v2302_v18 = vadd.f32 %v2301_v17, %v2300_v27  ;;  %v3066_v4 = vld [vmem:[#allocation7_spill] sm:$0xff] }
 0x132   : > { %v2264_v37 = vpop.f32.mrf.mxu0  ;;  %v2303_v33 = vpop.f32.mrf.mxu1  ;;  %v2299_v50 = vadd.f32 %v2298_v11, %v3066_v4 }
 0x133   : > { %v2265_v36 = vadd.f32 %v2264_v37, %v2263_v15  ;;  %v1677_v6 = vadd.f32 %v2302_v18, %v1612_v5 }
 0x134   : > { %v2304_v63 = vpop.f32.mrf.mxu1  ;;  %v1672_v25 = vadd.f32 %v2299_v50, %v1607_v1 }
 0x135   : > { %v1615_v19 = vadd.f32 %v2265_v36, %v1550_v3  ;;  %v2305_v38 = vadd.f32 %v2304_v63, %v2303_v33  ;;  %v2336_v40 = vpop.f32.mrf.mxu0 }
 0x136   : > { %v1726_v10 = vadd.f32 %v2336_v40, %v1661_v55 }
 0x137   : > { %v2340_v56 = vpop.f32.mrf.mxu1  ;;  %v1717_v59 = vpop.f32.mrf.mxu0  ;;  %v1680_v46 = vadd.f32 %v2305_v38, %v1615_v19 }
 0x138   : > { %v1718_v12 = vadd.f32 %v1717_v59, %v1653_v8  ;;  %v1742_v27 = vadd.f32 %v2340_v56, %v1677_v6  ;;  %v1831_v34 = vmul.f32 %v1726_v10, %v1726_v10 }
 0x139   : > { %v1733_v57 = vpop.f32.mrf.mxu1  ;;  %v2337_v9 = vpop.f32.mrf.mxu0 }
 0x13a   : > { %v1729_v22 = vadd.f32 %v2337_v9, %v1664_v61  ;;  %v1734_v15 = vadd.f32 %v1733_v57, %v1669_v13  ;;  %v1829_v2 = vmul.f32 %v1718_v12, %v1718_v12  ;;  %v1835_v54 = vmul.f32 %v1742_v27, %v1742_v27 }
 0x13b   : > { %v2341_v60 = vpop.f32.mrf.mxu1  ;;  %v1720_v51 = vpop.f32.mrf.mxu0 }
 0x13c   : > { %v2131_v62 = vpack.c.bf16 %v1729_v22, %v1726_v10  ;;  %v1745_v11 = vadd.f32 %v2341_v60, %v1680_v46  ;;  %v1721_v26 = vadd.f32 %v1720_v51, %v1656_v0  ;;  %v1832_v3 = vmul.f32 %v1729_v22, %v1729_v22 }
 0x13d   : > { %v1736_v14 = vpop.f32.mrf.mxu1  ;;  %v1833_v33 = vmul.f32 %v1734_v15, %v1734_v15 }
 0x13e   : > { %2143 = vst [vmem:[%s355_s23 + $0x8] sm:$0xff] %v2131_v62   ;;  %v2141_v28 = vpack.c.bf16 %v1745_v11, %v1742_v27  ;;  %v1737_v47 = vadd.f32 %v1736_v14, %v1672_v25  ;;  %v2126_v31 = vpack.c.bf16 %v1721_v26, %v1718_v12  ;;  %v1815_v17 = vadd.f32 %v1721_v26, %v1718_v12 }
 0x13f   : > { %v1830_v58 = vmul.f32 %v1721_v26, %v1721_v26  ;;  %v1836_v19 = vmul.f32 %v1745_v11, %v1745_v11 }
 0x140   : > { %2145 = vst [vmem:[%s355_s23 + $0x18] sm:$0xff] %v2141_v28   ;;  %v2136_v16 = vpack.c.bf16 %v1737_v47, %v1734_v15  ;;  %2127 = vst [vmem:[%s355_s23] sm:$0xff] %v2126_v31   ;;  %v1816_v29 = vadd.f32 %v1815_v17, %v1726_v10  ;;  %v1834_v48 = vmul.f32 %v1737_v47, %v1737_v47 }
 0x141   : > { %v1837_v37 = vadd.f32 %v1830_v58, %v1829_v2 }
 0x142   : > { %2144 = vst [vmem:[%s355_s23 + $0x10] sm:$0xff] %v2136_v16   ;;  %v1817_v32 = vadd.f32 %v1816_v29, %v1729_v22 }
 0x143   : > { %v1838_v30 = vadd.f32 %v1837_v37, %v1831_v34 }
 0x144   : > { %v1818_v36 = vadd.f32 %v1817_v32, %v1734_v15 }
 0x145   : > { %v1839_v39 = vadd.f32 %v1838_v30, %v1832_v3 }
 0x146   : > { %v1819_v41 = vadd.f32 %v1818_v36, %v1737_v47 }
 0x147   : > { %v1840_v52 = vadd.f32 %v1839_v39, %v1833_v33 }
 0x148   : > { %v1820_v5 = vadd.f32 %v1819_v41, %v1742_v27 }
 0x149   : > { %v1841_v18 = vadd.f32 %v1840_v52, %v1834_v48 }
 0x14a   : > { %v1821_v63 = vadd.f32 %v1820_v5, %v1745_v11 }
 0x14b   : > { %v1842_v20 = vadd.f32 %v1841_v18, %v1835_v54 }
 0x14c   : > { %v1822_v35 = vrot.slane %v1821_v63, 4 }
 0x14d   : > { %v1843_v21 = vadd.f32 %v1842_v20, %v1836_v19 }
 0x14e   : > { %v1823_v23 = vadd.f32 %v1822_v35, %v1821_v63 }
 0x14f   : > { %v1844_v24 = vrot.slane %v1843_v21, 4 }
 0x150   : > { %v1824_v38 = vrot.slane %v1823_v23, 2 }
 0x151   : > { %v1845_v40 = vadd.f32 %v1844_v24, %v1843_v21 }
 0x152   : > { %v1825_v42 = vadd.f32 %v1824_v38, %v1823_v23 }
 0x153   : > { %v1846_v43 = vrot.slane %v1845_v40, 2 }
 0x154   : > { %v1826_v44 = vrot.slane %v1825_v42, 1 }
 0x155   : > { %v1847_v7 = vadd.f32 %v1846_v43, %v1845_v40 }
 0x156   : > { %v1827_v45 = vadd.f32 %v1826_v44, %v1825_v42 }
 0x157   : > { %v1848_v49 = vrot.slane %v1847_v7, 1 }
 0x158   : > { %1828 = vst [vmem:[%s363_s27] sm:$0x1] %v1827_v45 }
 0x159   : > { %v1849_v53 = vadd.f32 %v1848_v49, %v1847_v7 }
 0x15b   : > { %1850 = vst [vmem:[%s363_s27 + $0x1] sm:$0x1] %v1849_v53 }
 0x15c PF: > { %s16_s20 = sadd.s32 1, %s2477_s20   ;;  %s3067_s18 = smov %s2473_s19 }
 0x15d   : > { %p13_p6 = scmp.ge.s32.totalorder %s16_s20, 4   ;;  %s3068_s19 = smov %s3070_s21 }
 0x15f   :  { %15 = sbr.rel (!%p13_p6) target bundleno = 2 (0x2), region = 95 }

// kernel: bottleneck_forward.8
= control target key start
LH: loop header
LB: loop body
LE: loop exit
PB: predicated region body
PF: predicated region fallthrough
CT: control target
= control target key end

     0   :  { %s885_s12 = smov 0   ;;  %s887_s13 = smov 0   ;;  %s963_s0 = inlined_call_operand.vmem [shape: bf16[128,128], index: 0, kind: input, shape index: {}]   ;;  %s964_s1 = inlined_call_operand.vmem [shape: bf16[128,128], index: 1, kind: input, shape index: {}]   ;;  %s965_s2 = inlined_call_operand.vmem [shape: bf16[128,128], index: 2, kind: output, shape index: {0}]   ;;  %s966_s3 = inlined_call_operand.vmem [shape: f32[16,128], index: 3, kind: output, shape index: {1}]  }
   0x1   :  { %s889_s14 = smov 0  }
   0x2 LB: > { %s33_s15 = sadd.s32 1, %s859_s13  ;;  %p694_p0 = scmp.ge.s32.totalorder %s863_s14, 1  ;;  %s863_s14 = sphi %s889_s14, %s14_s14   ;;  %s859_s13 = sphi %s887_s13, %s968_s13   ;;  %s855_s12 = sphi %s885_s12, %s967_s12  }
   0x3   : > { %p35_p1 = scmp.ge.s32.totalorder %s33_s15, 2  ;;  %p185_p2 = scmp.lt.s32.totalorder %s863_s14, 3 }
   0x5   : > { %s970_s15 = smov (%p35_p1, %s33_s15), 0  ;;  %p186_p3 = pnand %p694_p0, %p185_p2 }
   0x6   : > { %s695_s18 = sshll.u32 (!%p186_p3), %s855_s12, 3  ;;  %p257_p5 = scmp.lt.s32.totalorder (!%p186_p3), %s855_s12, 1 }
   0x7   : > { %189 = sbr.rel (%p186_p3) target bundleno = 273 (0x111), region = 28  ;;  %p231_p4 = scmp.lt.s32.totalorder (!%p186_p3), %s695_s18, 15 }
   0xc   : > { %v829_v0 = vld [vmem:[%s964_s1 + $0x38] sm:$0xff]   ;;  %v830_v1 = vld [vmem:[%s964_s1 + $0x30] sm:$0xff]   ;;  %s972_s18 = smov (!%p231_p4, %s695_s18), 15  ;;  %v831_v2 = vld [vmem:[%s964_s1 + $0x28] sm:$0xff]   ;;  %s974_s12 = smov (!%p257_p5, %s855_s12), 1 }
   0xd   : > { %765 = vmatprep.subr.bf16.mxu0 %v829_v0  ;;  %789 = vmatprep.subr.bf16.mxu1 %v829_v0  ;;  %s696_s23 = sshll.u32 %s972_s18, 2  ;;  %v832_v3 = vld [vmem:[%s964_s1 + $0x20] sm:$0xff]   ;;  %v833_v6 = vld [vmem:[%s964_s1 + $0x18] sm:$0xff]   ;;  %v834_v7 = vld [vmem:[%s964_s1 + $0x10] sm:$0xff]   ;;  %s699_s17 = sshll.u32 %s974_s12, 3 }
   0xe   : > { %766 = vmatpush3.bf16.msra.mxu0 %v829_v0  ;;  %797 = vmatpush3.bf16.msra.mxu1 %v829_v0  ;;  %s923_s26 = scalar_lea.vmem %s963_s0, %s696_s23  ;;  %v835_v8 = vld [vmem:[%s964_s1 + $0x8] sm:$0xff]   ;;  %v836_v9 = vld [vmem:[%s964_s1] sm:$0xff]   ;;  %s255_s16 = scalar_lea.vmem %s965_s2, %s696_s23 }
   0xf   : > { %767 = vmatprep.subr.bf16.mxu0 %v830_v1  ;;  %790 = vmatprep.subr.bf16.mxu1 %v830_v1  ;;  %v837_v4 = vld [vmem:[%s923_s26] sm:$0xff]   ;;  %v839_v5 = vld [vmem:[%s923_s26 + $0x10] sm:$0xff]   ;;  %v838_v10 = vld [vmem:[%s923_s26 + $0x8] sm:$0xff]   ;;  %s263_s20 = scalar_lea.vmem %s966_s3, %s699_s17 }
  0x10   : > { %781 = vmatprep.mubr.bf16.mxu0 %v837_v4  ;;  %785 = vmatprep.mubr.bf16.mxu1 %v839_v5  ;;  %v840_v11 = vld [vmem:[%s923_s26 + $0x18] sm:$0xff]  }
  0x12   : > { %768 = vmatpush3.bf16.msra.mxu0 %v830_v1  ;;  %798 = vmatpush3.bf16.msra.mxu1 %v830_v1 }
  0x13   : > { %769 = vmatprep.subr.bf16.mxu0 %v831_v2  ;;  %791 = vmatprep.subr.bf16.mxu1 %v831_v2 }
  0x16   : > { %770 = vmatpush3.bf16.msra.mxu0 %v831_v2  ;;  %799 = vmatpush3.bf16.msra.mxu1 %v831_v2 }
  0x17   : > { %771 = vmatprep.subr.bf16.mxu0 %v832_v3  ;;  %792 = vmatprep.subr.bf16.mxu1 %v832_v3 }
  0x1a   : > { %772 = vmatpush3.bf16.msra.mxu0 %v832_v3  ;;  %800 = vmatpush3.bf16.msra.mxu1 %v832_v3 }
  0x1b   : > { %773 = vmatprep.subr.bf16.mxu0 %v833_v6  ;;  %793 = vmatprep.subr.bf16.mxu1 %v833_v6 }
  0x1e   : > { %774 = vmatpush3.bf16.msra.mxu0 %v833_v6  ;;  %801 = vmatpush3.bf16.msra.mxu1 %v833_v6 }
  0x1f   : > { %775 = vmatprep.subr.bf16.mxu0 %v834_v7  ;;  %794 = vmatprep.subr.bf16.mxu1 %v834_v7 }
  0x22   : > { %776 = vmatpush3.bf16.msra.mxu0 %v834_v7  ;;  %802 = vmatpush3.bf16.msra.mxu1 %v834_v7 }
  0x23   : > { %777 = vmatprep.subr.bf16.mxu0 %v835_v8  ;;  %795 = vmatprep.subr.bf16.mxu1 %v835_v8 }
  0x26   : > { %778 = vmatpush3.bf16.msra.mxu0 %v835_v8  ;;  %803 = vmatpush3.bf16.msra.mxu1 %v835_v8 }
  0x27   : > { %779 = vmatprep.subr.bf16.mxu0 %v836_v9  ;;  %796 = vmatprep.subr.bf16.mxu1 %v836_v9 }
  0x2a   : > { %780 = vmatpush3.bf16.msra.mxu0 %v836_v9  ;;  %804 = vmatpush3.bf16.msra.mxu1 %v836_v9 }
  0x2d   : > { %782 = vmatmul.mubr.bf16.vlgmr.msra.gmra.mxu0 %v838_v10  ;;  %786 = vmatmul.mubr.bf16.vlgmr.msra.gmra.mxu1 %v840_v11 }
  0xed   : > { %v783_v12 = vpop.f32.mrf.mxu0  ;;  %v787_v13 = vpop.f32.mrf.mxu1 }
  0xee   : > { %v529_v27 = vmul.f32 %v783_v12, %v783_v12  ;;  %v533_v39 = vmul.f32 %v787_v13, %v787_v13 }
  0xef   : > { %v415_v14 = vpop.f32.mrf.mxu0  ;;  %v431_v15 = vpop.f32.mrf.mxu1 }
  0xf0   : > { %v527_v20 = vmul.f32 %v415_v14, %v415_v14  ;;  %v531_v33 = vmul.f32 %v431_v15, %v431_v15 }
  0xf1   : > { %v784_v16 = vpop.f32.mrf.mxu0  ;;  %v788_v17 = vpop.f32.mrf.mxu1 }
  0xf2   : > { %v738_v18 = vpack.c.bf16 %v784_v16, %v783_v12  ;;  %v748_v19 = vpack.c.bf16 %v788_v17, %v787_v13  ;;  %v530_v30 = vmul.f32 %v784_v16, %v784_v16  ;;  %v534_v42 = vmul.f32 %v788_v17, %v788_v17 }
  0xf3   : > { %v418_v21 = vpop.f32.mrf.mxu0  ;;  %v434_v22 = vpop.f32.mrf.mxu1 }
  0xf4   : > { %750 = vst [vmem:[%s255_s16 + $0x8] sm:$0xff] %v738_v18   ;;  %v733_v23 = vpack.c.bf16 %v418_v21, %v415_v14  ;;  %v513_v24 = vadd.f32 %v418_v21, %v415_v14  ;;  %v528_v25 = vmul.f32 %v418_v21, %v418_v21  ;;  %752 = vst [vmem:[%s255_s16 + $0x18] sm:$0xff] %v748_v19  }
  0xf5   : > { %v743_v26 = vpack.c.bf16 %v434_v22, %v431_v15  ;;  %v532_v37 = vmul.f32 %v434_v22, %v434_v22 }
  0xf6   : > { %734 = vst [vmem:[%s255_s16] sm:$0xff] %v733_v23   ;;  %v514_v28 = vadd.f32 %v783_v12, %v513_v24  ;;  %v535_v29 = vadd.f32 %v528_v25, %v527_v20 }
  0xf7   : > { %751 = vst [vmem:[%s255_s16 + $0x10] sm:$0xff] %v743_v26  }
  0xf8   : > { %v536_v31 = vadd.f32 %v535_v29, %v529_v27  ;;  %v515_v32 = vadd.f32 %v784_v16, %v514_v28 }
  0xfa   : > { %v516_v34 = vadd.f32 %v515_v32, %v431_v15  ;;  %v537_v35 = vadd.f32 %v536_v31, %v530_v30 }
  0xfc   : > { %v517_v36 = vadd.f32 %v516_v34, %v434_v22  ;;  %v538_v38 = vadd.f32 %v537_v35, %v531_v33 }
  0xfe   : > { %v518_v40 = vadd.f32 %v787_v13, %v517_v36  ;;  %v539_v41 = vadd.f32 %v538_v38, %v532_v37 }
 0x100   : > { %v519_v43 = vadd.f32 %v788_v17, %v518_v40  ;;  %v540_v44 = vadd.f32 %v539_v41, %v533_v39 }
 0x102   : > { %v520_v45 = vrot.slane %v519_v43, 4  ;;  %v541_v46 = vadd.f32 %v540_v44, %v534_v42 }
 0x104   : > { %v521_v47 = vadd.f32 %v520_v45, %v519_v43  ;;  %v542_v48 = vrot.slane %v541_v46, 4 }
 0x106   : > { %v522_v49 = vrot.slane %v521_v47, 2  ;;  %v543_v50 = vadd.f32 %v542_v48, %v541_v46 }
 0x108   : > { %v523_v51 = vadd.f32 %v522_v49, %v521_v47  ;;  %v544_v52 = vrot.slane %v543_v50, 2 }
 0x10a   : > { %v524_v53 = vrot.slane %v523_v51, 1  ;;  %v545_v54 = vadd.f32 %v544_v52, %v543_v50 }
 0x10c   : > { %v525_v55 = vadd.f32 %v524_v53, %v523_v51  ;;  %v546_v56 = vrot.slane %v545_v54, 1 }
 0x10e   : > { %526 = vst [vmem:[%s263_s20] sm:$0x1] %v525_v55  ;;  %v547_v57 = vadd.f32 %v546_v56, %v545_v54 }
 0x110   : > { %548 = vst [vmem:[%s263_s20 + $0x1] sm:$0x1] %v547_v57 }
 0x111 PF: > { %s14_s14 = sadd.s32 1, %s863_s14   ;;  %s967_s12 = smov %s859_s13 }
 0x112   : > { %p11_p6 = scmp.ge.s32.totalorder %s14_s14, 4   ;;  %s968_s13 = smov %s970_s15 }
 0x114   :  { %13 = sbr.rel (!%p11_p6) target bundleno = 2 (0x2), region = 81 }

// kernel: bottleneck_forward.9
= control target key start
LH: loop header
LB: loop body
LE: loop exit
PB: predicated region body
PF: predicated region fallthrough
CT: control target
= control target key end

     0   :  { %s647_s0 = inlined_call_operand.vmem [shape: bf16[128,128], index: 0, kind: input, shape index: {}, may-alias: {0,6}]   ;;  %s648_s1 = inlined_call_operand.vmem [shape: f32[1,128], index: 1, kind: input, shape index: {}]   ;;  %s649_s2 = inlined_call_operand.vmem [shape: f32[1,128], index: 2, kind: input, shape index: {}]   ;;  %s650_s3 = inlined_call_operand.vmem [shape: bf16[128,128], index: 3, kind: input, shape index: {}]   ;;  %s651_s4 = inlined_call_operand.vmem [shape: f32[1,128], index: 4, kind: input, shape index: {}]   ;;  %s652_s5 = inlined_call_operand.vmem [shape: f32[1,128], index: 5, kind: input, shape index: {}]   ;;  %s653_s6 = inlined_call_operand.vmem [shape: bf16[128,128], index: 6, kind: output, shape index: {}, may-alias: {0,6}]  }
   0x1   :  { %v332_v0 = vld [vmem:[%s647_s0] sm:$0xff]   ;;  %v435_v9 = vld [vmem:[%s647_s0 + $0x8] sm:$0xff]   ;;  %v436_v20 = vld [vmem:[%s647_s0 + $0x10] sm:$0xff]  }
   0x2   :  { %v497_v1 = vld [vmem:[%s648_s1] ss:$0 sm:$0xff]  ;;  %v333_v2 = vunpack.c.l.bf16 %v332_v0  ;;  %v334_v3 = vunpack.c.h.bf16 %v332_v0  ;;  %v442_v10 = vld [vmem:[%s650_s3 + $0x8] sm:$0xff]   ;;  %v337_v14 = vunpack.c.l.bf16 %v435_v9  ;;  %v338_v15 = vunpack.c.h.bf16 %v435_v9  ;;  %v443_v29 = vld [vmem:[%s650_s3 + $0x10] sm:$0xff]  }
   0x3   :  { %v364_v4 = vld [vmem:[%s650_s3] sm:$0xff]   ;;  %v369_v18 = vunpack.c.l.bf16 %v442_v10  ;;  %v370_v19 = vunpack.c.h.bf16 %v442_v10  ;;  %v341_v32 = vunpack.c.l.bf16 %v436_v20  ;;  %v342_v33 = vunpack.c.h.bf16 %v436_v20  ;;  %v437_v42 = vld [vmem:[%s647_s0 + $0x18] sm:$0xff]  }
   0x4   :  { %v505_v5 = vld [vmem:[%s651_s4] ss:$0 sm:$0xff]  ;;  %v365_v7 = vunpack.c.l.bf16 %v364_v4  ;;  %v366_v8 = vunpack.c.h.bf16 %v364_v4  ;;  %v62_v11 = vmul.f32 %v333_v2, %v497_v1  ;;  %v63_v12 = vmul.f32 %v334_v3, %v497_v1  ;;  %v444_v47 = vld [vmem:[%s650_s3 + $0x18] sm:$0xff]  }
   0x5   :  { %v510_v6 = vld [vmem:[%s649_s2] ss:$0 sm:$0xff]  ;;  %v64_v23 = vmul.f32 %v337_v14, %v497_v1  ;;  %v65_v24 = vmul.f32 %v338_v15, %v497_v1  ;;  %v142_v27 = vmul.f32 %v369_v18, %v505_v5  ;;  %v143_v28 = vmul.f32 %v370_v19, %v505_v5 }
   0x6   :  { %v523_v13 = vld [vmem:[%s652_s5] ss:$0 sm:$0xff]  ;;  %v140_v16 = vmul.f32 %v365_v7, %v505_v5  ;;  %v141_v17 = vmul.f32 %v366_v8, %v505_v5  ;;  %v85_v21 = vadd.f32 %v510_v6, %v62_v11  ;;  %v86_v22 = vadd.f32 %v510_v6, %v63_v12 }
   0x7   :  { %v87_v30 = vadd.f32 %v510_v6, %v64_v23  ;;  %v88_v31 = vadd.f32 %v510_v6, %v65_v24  ;;  %v165_v36 = vadd.f32 %v523_v13, %v142_v27  ;;  %v166_v37 = vadd.f32 %v523_v13, %v143_v28  ;;  %v438_v52 = vld [vmem:[%s647_s0 + $0x20] sm:$0xff]   ;;  %v446_v23 = vld [vmem:[%s650_s3 + $0x28] sm:$0xff]  }
   0x8   :  { %v163_v25 = vadd.f32 %v523_v13, %v140_v16  ;;  %v164_v26 = vadd.f32 %v523_v13, %v141_v17  ;;  %v66_v38 = vmul.f32 %v341_v32, %v497_v1  ;;  %v67_v39 = vmul.f32 %v342_v33, %v497_v1  ;;  %v445_v8 = vld [vmem:[%s650_s3 + $0x20] sm:$0xff]  }
   0x9   :  { %v373_v40 = vunpack.c.l.bf16 %v443_v29  ;;  %v374_v41 = vunpack.c.h.bf16 %v443_v29  ;;  %v181_v45 = vadd.f32 %v165_v36, %v87_v30  ;;  %v182_v46 = vadd.f32 %v166_v37, %v88_v31 }
   0xa   :  { %v179_v34 = vadd.f32 %v163_v25, %v85_v21  ;;  %v180_v35 = vadd.f32 %v164_v26, %v86_v22  ;;  %v89_v48 = vadd.f32 %v510_v6, %v66_v38  ;;  %v90_v49 = vadd.f32 %v510_v6, %v67_v39 }
   0xb   :  { %v144_v50 = vmul.f32 %v373_v40, %v505_v5  ;;  %v145_v51 = vmul.f32 %v374_v41, %v505_v5  ;;  %v197_v54 = vmax.f32 %v181_v45, 0.0  ;;  %v198_v55 = vmax.f32 %v182_v46, 0.0  ;;  %v447_v45 = vld [vmem:[%s650_s3 + $0x30] sm:$0xff]  }
   0xc   :  { %v195_v43 = vmax.f32 %v179_v34, 0.0  ;;  %v196_v44 = vmax.f32 %v180_v35, 0.0  ;;  %v345_v56 = vunpack.c.l.bf16 %v437_v42  ;;  %v346_v59 = vunpack.c.h.bf16 %v437_v42 }
   0xd   :  { %v167_v57 = vadd.f32 %v523_v13, %v144_v50  ;;  %v168_v58 = vadd.f32 %v523_v13, %v145_v51  ;;  %v377_v60 = vunpack.c.l.bf16 %v444_v47  ;;  %v403_v61 = vpack.c.bf16 %v198_v55, %v197_v54 }
   0xe   :  { %v398_v53 = vpack.c.bf16 %v196_v44, %v195_v43  ;;  %v68_v62 = vmul.f32 %v345_v56, %v497_v1  ;;  %v378_v63 = vunpack.c.h.bf16 %v444_v47  ;;  %v349_v0 = vunpack.c.l.bf16 %v438_v52 }
   0xf   :  { %v183_v2 = vadd.f32 %v167_v57, %v89_v48  ;;  %v184_v3 = vadd.f32 %v168_v58, %v90_v49  ;;  %v69_v4 = vmul.f32 %v346_v59, %v497_v1  ;;  %v146_v7 = vmul.f32 %v377_v60, %v505_v5  ;;  %449 = vst [vmem:[%s653_s6 + $0x8] sm:$0xff] %v403_v61  }
  0x10   :  { %399 = vst [vmem:[%s653_s6] sm:$0xff] %v398_v53   ;;  %v91_v9 = vadd.f32 %v510_v6, %v68_v62  ;;  %v147_v10 = vmul.f32 %v378_v63, %v505_v5  ;;  %v350_v11 = vunpack.c.h.bf16 %v438_v52  ;;  %v70_v12 = vmul.f32 %v349_v0, %v497_v1 }
  0x11   :  { %v199_v15 = vmax.f32 %v183_v2, 0.0  ;;  %v200_v16 = vmax.f32 %v184_v3, 0.0  ;;  %v92_v17 = vadd.f32 %v510_v6, %v69_v4  ;;  %v169_v18 = vadd.f32 %v523_v13, %v146_v7  ;;  %v448_v4 = vld [vmem:[%s650_s3 + $0x38] sm:$0xff]  }
  0x12   :  { %v170_v19 = vadd.f32 %v523_v13, %v147_v10  ;;  %v71_v20 = vmul.f32 %v350_v11, %v497_v1  ;;  %v93_v21 = vadd.f32 %v510_v6, %v70_v12  ;;  %v381_v22 = vunpack.c.l.bf16 %v445_v8 }
  0x13   :  { %v408_v24 = vpack.c.bf16 %v200_v16, %v199_v15  ;;  %v185_v25 = vadd.f32 %v169_v18, %v91_v9  ;;  %v382_v26 = vunpack.c.h.bf16 %v445_v8  ;;  %v385_v36 = vunpack.c.l.bf16 %v446_v23 }
  0x14   :  { %v186_v28 = vadd.f32 %v170_v19, %v92_v17  ;;  %v94_v29 = vadd.f32 %v510_v6, %v71_v20  ;;  %v148_v30 = vmul.f32 %v381_v22, %v505_v5  ;;  %v386_v40 = vunpack.c.h.bf16 %v446_v23 }
  0x15   :  { %v201_v33 = vmax.f32 %v185_v25, 0.0  ;;  %v149_v34 = vmul.f32 %v382_v26, %v505_v5  ;;  %v150_v43 = vmul.f32 %v385_v36, %v505_v5  ;;  %v389_v57 = vunpack.c.l.bf16 %v447_v45 }
  0x16   :  { %v202_v37 = vmax.f32 %v186_v28, 0.0  ;;  %v171_v38 = vadd.f32 %v523_v13, %v148_v30  ;;  %v151_v49 = vmul.f32 %v386_v40, %v505_v5  ;;  %v390_v58 = vunpack.c.h.bf16 %v447_v45 }
  0x17   :  { %v439_v14 = vld [vmem:[%s647_s0 + $0x28] sm:$0xff]   ;;  %v440_v32 = vld [vmem:[%s647_s0 + $0x30] sm:$0xff]   ;;  %v172_v41 = vadd.f32 %v523_v13, %v149_v34  ;;  %v173_v51 = vadd.f32 %v523_v13, %v150_v43  ;;  %v152_v0 = vmul.f32 %v389_v57, %v505_v5  ;;  %v393_v17 = vunpack.c.l.bf16 %v448_v4 }
  0x18   :  { %v353_v27 = vunpack.c.l.bf16 %v439_v14  ;;  %v354_v31 = vunpack.c.h.bf16 %v439_v14  ;;  %450 = vst [vmem:[%s653_s6 + $0x10] sm:$0xff] %v408_v24   ;;  %v357_v44 = vunpack.c.l.bf16 %v440_v32  ;;  %v413_v46 = vpack.c.bf16 %v202_v37, %v201_v33 }
  0x19   :  { %v187_v47 = vadd.f32 %v171_v38, %v93_v21  ;;  %v188_v50 = vadd.f32 %v172_v41, %v94_v29  ;;  %v358_v52 = vunpack.c.h.bf16 %v440_v32  ;;  %v174_v56 = vadd.f32 %v523_v13, %v151_v49 }
  0x1a   :  { %v72_v35 = vmul.f32 %v353_v27, %v497_v1  ;;  %v73_v39 = vmul.f32 %v354_v31, %v497_v1  ;;  %v74_v53 = vmul.f32 %v357_v44, %v497_v1  ;;  %v153_v2 = vmul.f32 %v390_v58, %v505_v5 }
  0x1b   :  { %v203_v55 = vmax.f32 %v187_v47, 0.0  ;;  %v204_v59 = vmax.f32 %v188_v50, 0.0  ;;  %v75_v61 = vmul.f32 %v358_v52, %v497_v1  ;;  %v175_v12 = vadd.f32 %v523_v13, %v152_v0 }
  0x1c   :  { %v95_v42 = vadd.f32 %v510_v6, %v72_v35  ;;  %v96_v48 = vadd.f32 %v510_v6, %v73_v39  ;;  %v97_v62 = vadd.f32 %v510_v6, %v74_v53  ;;  %v176_v14 = vadd.f32 %v523_v13, %v153_v2 }
  0x1d   :  { %v418_v7 = vpack.c.bf16 %v204_v59, %v203_v55  ;;  %v98_v9 = vadd.f32 %v510_v6, %v75_v61  ;;  %v394_v18 = vunpack.c.h.bf16 %v448_v4  ;;  %v154_v24 = vmul.f32 %v393_v17, %v505_v5 }
  0x1e   :  { %v189_v60 = vadd.f32 %v173_v51, %v95_v42  ;;  %v190_v63 = vadd.f32 %v174_v56, %v96_v48  ;;  %v191_v20 = vadd.f32 %v175_v12, %v97_v62 }
  0x1f   :  { %v441_v54 = vld [vmem:[%s647_s0 + $0x38] sm:$0xff]   ;;  %v192_v21 = vadd.f32 %v176_v14, %v98_v9  ;;  %v155_v25 = vmul.f32 %v394_v18, %v505_v5 }
  0x20   :  { %451 = vst [vmem:[%s653_s6 + $0x18] sm:$0xff] %v413_v46   ;;  %v361_v3 = vunpack.c.l.bf16 %v441_v54  ;;  %v205_v8 = vmax.f32 %v189_v60, 0.0  ;;  %v362_v10 = vunpack.c.h.bf16 %v441_v54  ;;  %v206_v11 = vmax.f32 %v190_v63, 0.0  ;;  %452 = vst [vmem:[%s653_s6 + $0x20] sm:$0xff] %v418_v7  }
  0x21   :  { %v207_v26 = vmax.f32 %v191_v20, 0.0  ;;  %v208_v27 = vmax.f32 %v192_v21, 0.0  ;;  %v178_v28 = vadd.f32 %v523_v13, %v155_v25 }
  0x22   :  { %v76_v15 = vmul.f32 %v361_v3, %v497_v1  ;;  %v77_v16 = vmul.f32 %v362_v10, %v497_v1  ;;  %v423_v19 = vpack.c.bf16 %v206_v11, %v205_v8  ;;  %v177_v1 = vadd.f32 %v523_v13, %v154_v24 }
  0x23   :  { %v428_v29 = vpack.c.bf16 %v208_v27, %v207_v26 }
  0x24   :  { %v99_v22 = vadd.f32 %v510_v6, %v76_v15  ;;  %v100_v23 = vadd.f32 %v510_v6, %v77_v16  ;;  %453 = vst [vmem:[%s653_s6 + $0x28] sm:$0xff] %v423_v19  }
  0x25   :  { %454 = vst [vmem:[%s653_s6 + $0x30] sm:$0xff] %v428_v29  }
  0x26   :  { %v193_v30 = vadd.f32 %v177_v1, %v99_v22  ;;  %v194_v31 = vadd.f32 %v178_v28, %v100_v23 }
  0x28   :  { %v209_v6 = vmax.f32 %v193_v30, 0.0  ;;  %v210_v32 = vmax.f32 %v194_v31, 0.0 }
  0x2a   :  { %v433_v5 = vpack.c.bf16 %v210_v32, %v209_v6 }
  0x2c   :  { %455 = vst [vmem:[%s653_s6 + $0x38] sm:$0xff] %v433_v5  }

</bundles_post_ra>
